<compile_context>
chip_gen: v5e
topology: v5e:2x2
jax: 0.10.0
libtpu: 0.0.40
codegen_flags: <defaults>
</compile_context>

<pallas_src>
import functools

import jax
import jax.numpy as jnp
from jax import lax
from jax.experimental import pallas as pl
from jax.experimental.pallas import tpu as pltpu

_PREC = lax.Precision.HIGHEST


# ----------------------------------------------------------------------------
# Fused kernel: joint (left|right) tanh-RNN recurrence + batched
# sigmoid(L @ R^T) output, all in VMEM, no grid.
# ----------------------------------------------------------------------------
def fused_simulate_adj_kernel(x_ref, wih_ref, b_ref, whh_ref,
                              rowm_ref, modm_ref, o_ref, hs_ref):
    T = x_ref.shape[0]
    H = rowm_ref.shape[1]            # per-side hidden size (= num_node * w_dim)

    # Hoisted input projection for BOTH RNNs and ALL time steps:
    # (T, D) @ (D, 2H) + folded biases. One parallel MXU pass.
    xw = jnp.dot(x_ref[...], wih_ref[...],
                 precision=_PREC,
                 preferred_element_type=jnp.float32) + b_ref[...]   # (T, 2H)

    whh = whh_ref[...]               # (2H, 2H) block-diagonal [W_hhL^T, W_hhR^T]

    # ---- Phase 1: serial recurrence; minimal per-step critical path ----
    h = jnp.tanh(xw[0:1, :])                                        # h_0 = 0
    hs_ref[0:1, :] = h
    for t in range(1, T):            # fully unrolled (T static & small)
        h = jnp.tanh(xw[t:t + 1, :] +
                     jnp.dot(h, whh, precision=_PREC,
                             preferred_element_type=jnp.float32))   # (1, 2H)
        hs_ref[t:t + 1, :] = h

    # ---- Phase 2: batched reshape-free bmm + sigmoid over all t ----
    hs = hs_ref[...]                 # (T, 2H)
    hL = hs[:, :H]                   # (T, H)
    hR = hs[:, H:]                   # (T, H)
    rowm = rowm_ref[...]             # (n, H)  rowmask
    modm = modm_ref[...]             # (H, H)  within-block-offset match mask

    BL = hL[:, None, :] * rowm[None, :, :]                          # (T, n, H)
    BR = hR[:, None, :] * rowm[None, :, :]                          # (T, n, H)
    BLM = lax.dot_general(BL, modm, (((2,), (0,)), ((), ())),
                          precision=_PREC,
                          preferred_element_type=jnp.float32)       # (T, n, H)
    s = lax.dot_general(BLM, BR, (((2,), (2,)), ((0,), (0,))),
                        precision=_PREC,
                        preferred_element_type=jnp.float32)         # (T, n, n)
    o_ref[...] = jax.nn.sigmoid(s)


# ----------------------------------------------------------------------------
# Wrapper
# ----------------------------------------------------------------------------
@functools.partial(jax.jit, static_argnames=("num_node", "w_dim"))
def simulate_adj_forward(z, params, *, num_node, w_dim):
    """z: (1, T, D) float32.  Returns (T, num_node, num_node)."""
    (wihL, whhL, bL), (wihR, whhR, bR) = params   # pre-transposed: (D,H),(H,H),(1,H)
    x = z[0]                                       # (T, D)
    T, D = x.shape
    H = num_node * w_dim
    assert wihL.shape == (D, H) and whhL.shape == (H, H) and bL.shape == (1, H)

    # Concatenate both RNNs' input projections / biases; build block-diag W_hh.
    wih_cat = jnp.concatenate([wihL, wihR], axis=1)                    # (D, 2H)
    b_cat = jnp.concatenate([bL, bR], axis=1)                          # (1, 2H)
    zeros = jnp.zeros((H, H), jnp.float32)
    whh_bd = jnp.block([[whhL, zeros], [zeros, whhR]])                 # (2H, 2H)

    # Constant masks for the reshape-free bmm identity.
    k = jnp.arange(H)
    rowmask = (k[None, :] // w_dim ==
               jnp.arange(num_node)[:, None]).astype(jnp.float32)      # (n, H)
    modmask = ((k[:, None] % w_dim) ==
               (k[None, :] % w_dim)).astype(jnp.float32)                # (H, H)

    vmem = pl.BlockSpec(memory_space=pltpu.MemorySpace.VMEM)
    out = pl.pallas_call(
        fused_simulate_adj_kernel,
        out_shape=jax.ShapeDtypeStruct((T, num_node, num_node), jnp.float32),
        in_specs=[vmem] * 6,
        out_specs=vmem,
        scratch_shapes=[pltpu.VMEM((T, 2 * H), jnp.float32)],
    )(x, wih_cat, b_cat, whh_bd, rowmask, modmask)
    return out


# ----------------------------------------------------------------------------
# Deterministic parameter init (uniform(-0.5, 0.5), as in init_rnn_weights)
# ----------------------------------------------------------------------------
def init_rnn_params(key, latent_dim, hidden):
    k1, k2, k3, k4 = jax.random.split(key, 4)
    w_ih = jax.random.uniform(k1, (hidden, latent_dim), jnp.float32, -0.5, 0.5)
    w_hh = jax.random.uniform(k2, (hidden, hidden), jnp.float32, -0.5, 0.5)
    b_ih = jax.random.uniform(k3, (hidden,), jnp.float32, -0.5, 0.5)
    b_hh = jax.random.uniform(k4, (hidden,), jnp.float32, -0.5, 0.5)
    # Pre-transpose for row-vector matmuls; fold the two biases together.
    return w_ih.T, w_hh.T, (b_ih + b_hh)[None, :]


def reference_forward(z, params, *, num_node, w_dim):
    """Pure-JAX reference of the PyTorch forward for verification."""
    (wihL, whhL, bL), (wihR, whhR, bR) = params
    x = z[0]
    T, D = x.shape
    H = num_node * w_dim

    def run_rnn(wih, whh, b):
        def step(h, xt):
            h = jnp.tanh(jnp.dot(xt[None, :], wih, precision=_PREC)
                         + jnp.dot(h, whh, precision=_PREC) + b)
            return h, h[0]
        _, ys = lax.scan(step, jnp.zeros((1, H), jnp.float32), x)
        return ys

    L = run_rnn(wihL, whhL, bL).reshape(T, num_node, w_dim)
    R = run_rnn(wihR, whhR, bR).reshape(T, num_node, w_dim)
    return jax.nn.sigmoid(jnp.einsum("tnw,tmw->tnm", L, R, precision=_PREC))


if __name__ == "__main__":
    # Small shapes consistent with the module's forward.
    latent_dim = 10
    w_dim = 4
    num_node = 8
    num_time = 8
    hidden = num_node * w_dim  # 32

    key = jax.random.PRNGKey(0)
    kz, kL, kR = jax.random.split(key, 3)

    z = jax.random.normal(kz, (1, num_time, latent_dim), jnp.float32)
    params = (init_rnn_params(kL, latent_dim, hidden),
              init_rnn_params(kR, latent_dim, hidden))

    out = simulate_adj_forward(z, params, num_node=num_node, w_dim=w_dim)
    out = jax.block_until_ready(out)

    ref = reference_forward(z, params, num_node=num_node, w_dim=w_dim)
    assert out.shape == (num_time, num_node, num_node)
    assert jnp.allclose(out, ref, rtol=1e-3, atol=1e-3), "mismatch vs reference"

    print("KERNEL_OK")
</pallas_src>

<mosaic_0001>
module attributes {stable_mosaic.version = 11 : i64} {
  func.func @fused_simulate_adj_kernel(%arg0: memref<8x10xf32, #tpu.memory_space<vmem>>, %arg1: memref<10x64xf32, #tpu.memory_space<vmem>>, %arg2: memref<1x64xf32, #tpu.memory_space<vmem>>, %arg3: memref<64x64xf32, #tpu.memory_space<vmem>>, %arg4: memref<8x32xf32, #tpu.memory_space<vmem>>, %arg5: memref<32x32xf32, #tpu.memory_space<vmem>>, %arg6: memref<8x8x8xf32, #tpu.memory_space<vmem>>, %arg7: memref<8x64xf32, #tpu.memory_space<vmem>>) attributes {dimension_semantics = [], scalar_prefetch = 0 : i64, scratch_operands = 1 : i64, tpu.core_type = #tpu.core_type<tc>} {
    %c0 = arith.constant 0 : index
    %c0_0 = arith.constant 0 : index
    %0 = vector.load %arg0[%c0, %c0_0] : memref<8x10xf32, #tpu.memory_space<vmem>>, vector<8x10xf32>
    %c0_1 = arith.constant 0 : index
    %c0_2 = arith.constant 0 : index
    %1 = vector.load %arg1[%c0_1, %c0_2] : memref<10x64xf32, #tpu.memory_space<vmem>>, vector<10x64xf32>
    %cst = arith.constant dense<0.000000e+00> : vector<8x64xf32>
    %2 = tpu.matmul %0, %1, %cst {dimension_numbers = #tpu.dot_dimension_numbers<[1], [0], [0], [1], [0, 0, 1, 1], [], []>, precision = #tpu.contract_precision<fp32>} : vector<8x10xf32>, vector<10x64xf32>, vector<8x64xf32> -> vector<8x64xf32>
    %c0_3 = arith.constant 0 : index
    %c0_4 = arith.constant 0 : index
    %3 = vector.load %arg2[%c0_3, %c0_4] : memref<1x64xf32, #tpu.memory_space<vmem>>, vector<1x64xf32>
    %4 = vector.broadcast %3 : vector<1x64xf32> to vector<8x64xf32>
    %5 = arith.addf %2, %4 : vector<8x64xf32>
    %c0_5 = arith.constant 0 : index
    %c0_6 = arith.constant 0 : index
    %6 = vector.load %arg3[%c0_5, %c0_6] : memref<64x64xf32, #tpu.memory_space<vmem>>, vector<64x64xf32>
    %7 = vector.extract_strided_slice %5 {offsets = [0, 0], sizes = [1, 64], strides = [1, 1]} : vector<8x64xf32> to vector<1x64xf32>
    %8 = math.tanh %7 : vector<1x64xf32>
    %c0_7 = arith.constant 0 : index
    %c0_8 = arith.constant 0 : index
    %9 = vector.load %arg7[%c0_7, %c0_8] : memref<8x64xf32, #tpu.memory_space<vmem>>, vector<1x64xf32>
    tpu.vector_store %arg7[%c0_7, %c0_8], %8 {strides = array<i32>} : memref<8x64xf32, #tpu.memory_space<vmem>>, vector<1x64xf32>,
    %10 = vector.extract_strided_slice %5 {offsets = [1, 0], sizes = [1, 64], strides = [1, 1]} : vector<8x64xf32> to vector<1x64xf32>
    %cst_9 = arith.constant dense<0.000000e+00> : vector<1x64xf32>
    %11 = tpu.matmul %8, %6, %cst_9 {dimension_numbers = #tpu.dot_dimension_numbers<[1], [0], [0], [1], [0, 0, 1, 1], [], []>, precision = #tpu.contract_precision<fp32>} : vector<1x64xf32>, vector<64x64xf32>, vector<1x64xf32> -> vector<1x64xf32>
    %12 = arith.addf %10, %11 : vector<1x64xf32>
    %13 = math.tanh %12 : vector<1x64xf32>
    %c1 = arith.constant 1 : index
    %c0_10 = arith.constant 0 : index
    %14 = vector.load %arg7[%c1, %c0_10] : memref<8x64xf32, #tpu.memory_space<vmem>>, vector<1x64xf32>
    tpu.vector_store %arg7[%c1, %c0_10], %13 {strides = array<i32>} : memref<8x64xf32, #tpu.memory_space<vmem>>, vector<1x64xf32>,
    %15 = vector.extract_strided_slice %5 {offsets = [2, 0], sizes = [1, 64], strides = [1, 1]} : vector<8x64xf32> to vector<1x64xf32>
    %cst_11 = arith.constant dense<0.000000e+00> : vector<1x64xf32>
    %16 = tpu.matmul %13, %6, %cst_11 {dimension_numbers = #tpu.dot_dimension_numbers<[1], [0], [0], [1], [0, 0, 1, 1], [], []>, precision = #tpu.contract_precision<fp32>} : vector<1x64xf32>, vector<64x64xf32>, vector<1x64xf32> -> vector<1x64xf32>
    %17 = arith.addf %15, %16 : vector<1x64xf32>
    %18 = math.tanh %17 : vector<1x64xf32>
    %c2 = arith.constant 2 : index
    %c0_12 = arith.constant 0 : index
    %19 = vector.load %arg7[%c2, %c0_12] : memref<8x64xf32, #tpu.memory_space<vmem>>, vector<1x64xf32>
    tpu.vector_store %arg7[%c2, %c0_12], %18 {strides = array<i32>} : memref<8x64xf32, #tpu.memory_space<vmem>>, vector<1x64xf32>,
    %20 = vector.extract_strided_slice %5 {offsets = [3, 0], sizes = [1, 64], strides = [1, 1]} : vector<8x64xf32> to vector<1x64xf32>
    %cst_13 = arith.constant dense<0.000000e+00> : vector<1x64xf32>
    %21 = tpu.matmul %18, %6, %cst_13 {dimension_numbers = #tpu.dot_dimension_numbers<[1], [0], [0], [1], [0, 0, 1, 1], [], []>, precision = #tpu.contract_precision<fp32>} : vector<1x64xf32>, vector<64x64xf32>, vector<1x64xf32> -> vector<1x64xf32>
    %22 = arith.addf %20, %21 : vector<1x64xf32>
    %23 = math.tanh %22 : vector<1x64xf32>
    %c3 = arith.constant 3 : index
    %c0_14 = arith.constant 0 : index
    %24 = vector.load %arg7[%c3, %c0_14] : memref<8x64xf32, #tpu.memory_space<vmem>>, vector<1x64xf32>
    tpu.vector_store %arg7[%c3, %c0_14], %23 {strides = array<i32>} : memref<8x64xf32, #tpu.memory_space<vmem>>, vector<1x64xf32>,
    %25 = vector.extract_strided_slice %5 {offsets = [4, 0], sizes = [1, 64], strides = [1, 1]} : vector<8x64xf32> to vector<1x64xf32>
    %cst_15 = arith.constant dense<0.000000e+00> : vector<1x64xf32>
    %26 = tpu.matmul %23, %6, %cst_15 {dimension_numbers = #tpu.dot_dimension_numbers<[1], [0], [0], [1], [0, 0, 1, 1], [], []>, precision = #tpu.contract_precision<fp32>} : vector<1x64xf32>, vector<64x64xf32>, vector<1x64xf32> -> vector<1x64xf32>
    %27 = arith.addf %25, %26 : vector<1x64xf32>
    %28 = math.tanh %27 : vector<1x64xf32>
    %c4 = arith.constant 4 : index
    %c0_16 = arith.constant 0 : index
    %29 = vector.load %arg7[%c4, %c0_16] : memref<8x64xf32, #tpu.memory_space<vmem>>, vector<1x64xf32>
    tpu.vector_store %arg7[%c4, %c0_16], %28 {strides = array<i32>} : memref<8x64xf32, #tpu.memory_space<vmem>>, vector<1x64xf32>,
    %30 = vector.extract_strided_slice %5 {offsets = [5, 0], sizes = [1, 64], strides = [1, 1]} : vector<8x64xf32> to vector<1x64xf32>
    %cst_17 = arith.constant dense<0.000000e+00> : vector<1x64xf32>
    %31 = tpu.matmul %28, %6, %cst_17 {dimension_numbers = #tpu.dot_dimension_numbers<[1], [0], [0], [1], [0, 0, 1, 1], [], []>, precision = #tpu.contract_precision<fp32>} : vector<1x64xf32>, vector<64x64xf32>, vector<1x64xf32> -> vector<1x64xf32>
    %32 = arith.addf %30, %31 : vector<1x64xf32>
    %33 = math.tanh %32 : vector<1x64xf32>
    %c5 = arith.constant 5 : index
    %c0_18 = arith.constant 0 : index
    %34 = vector.load %arg7[%c5, %c0_18] : memref<8x64xf32, #tpu.memory_space<vmem>>, vector<1x64xf32>
    tpu.vector_store %arg7[%c5, %c0_18], %33 {strides = array<i32>} : memref<8x64xf32, #tpu.memory_space<vmem>>, vector<1x64xf32>,
    %35 = vector.extract_strided_slice %5 {offsets = [6, 0], sizes = [1, 64], strides = [1, 1]} : vector<8x64xf32> to vector<1x64xf32>
    %cst_19 = arith.constant dense<0.000000e+00> : vector<1x64xf32>
    %36 = tpu.matmul %33, %6, %cst_19 {dimension_numbers = #tpu.dot_dimension_numbers<[1], [0], [0], [1], [0, 0, 1, 1], [], []>, precision = #tpu.contract_precision<fp32>} : vector<1x64xf32>, vector<64x64xf32>, vector<1x64xf32> -> vector<1x64xf32>
    %37 = arith.addf %35, %36 : vector<1x64xf32>
    %38 = math.tanh %37 : vector<1x64xf32>
    %c6 = arith.constant 6 : index
    %c0_20 = arith.constant 0 : index
    %39 = vector.load %arg7[%c6, %c0_20] : memref<8x64xf32, #tpu.memory_space<vmem>>, vector<1x64xf32>
    tpu.vector_store %arg7[%c6, %c0_20], %38 {strides = array<i32>} : memref<8x64xf32, #tpu.memory_space<vmem>>, vector<1x64xf32>,
    %40 = vector.extract_strided_slice %5 {offsets = [7, 0], sizes = [1, 64], strides = [1, 1]} : vector<8x64xf32> to vector<1x64xf32>
    %cst_21 = arith.constant dense<0.000000e+00> : vector<1x64xf32>
    %41 = tpu.matmul %38, %6, %cst_21 {dimension_numbers = #tpu.dot_dimension_numbers<[1], [0], [0], [1], [0, 0, 1, 1], [], []>, precision = #tpu.contract_precision<fp32>} : vector<1x64xf32>, vector<64x64xf32>, vector<1x64xf32> -> vector<1x64xf32>
    %42 = arith.addf %40, %41 : vector<1x64xf32>
    %43 = math.tanh %42 : vector<1x64xf32>
    %c7 = arith.constant 7 : index
    %c0_22 = arith.constant 0 : index
    %44 = vector.load %arg7[%c7, %c0_22] : memref<8x64xf32, #tpu.memory_space<vmem>>, vector<1x64xf32>
    tpu.vector_store %arg7[%c7, %c0_22], %43 {strides = array<i32>} : memref<8x64xf32, #tpu.memory_space<vmem>>, vector<1x64xf32>,
    %c0_23 = arith.constant 0 : index
    %c0_24 = arith.constant 0 : index
    %45 = vector.load %arg7[%c0_23, %c0_24] : memref<8x64xf32, #tpu.memory_space<vmem>>, vector<8x64xf32>
    %46 = vector.extract_strided_slice %45 {offsets = [0, 0], sizes = [8, 32], strides = [1, 1]} : vector<8x64xf32> to vector<8x32xf32>
    %47 = vector.extract_strided_slice %45 {offsets = [0, 32], sizes = [8, 32], strides = [1, 1]} : vector<8x64xf32> to vector<8x32xf32>
    %c0_25 = arith.constant 0 : index
    %c0_26 = arith.constant 0 : index
    %48 = vector.load %arg4[%c0_25, %c0_26] : memref<8x32xf32, #tpu.memory_space<vmem>>, vector<8x32xf32>
    %c0_27 = arith.constant 0 : index
    %c0_28 = arith.constant 0 : index
    %49 = vector.load %arg5[%c0_27, %c0_28] : memref<32x32xf32, #tpu.memory_space<vmem>>, vector<32x32xf32>
    %50 = vector.shape_cast %46 : vector<8x32xf32> to vector<8x1x32xf32>
    %51 = vector.shape_cast %48 : vector<8x32xf32> to vector<1x8x32xf32>
    %52 = vector.broadcast %50 : vector<8x1x32xf32> to vector<8x8x32xf32>
    %53 = vector.broadcast %51 : vector<1x8x32xf32> to vector<8x8x32xf32>
    %54 = arith.mulf %52, %53 : vector<8x8x32xf32>
    %55 = vector.shape_cast %47 : vector<8x32xf32> to vector<8x1x32xf32>
    %56 = vector.shape_cast %48 : vector<8x32xf32> to vector<1x8x32xf32>
    %57 = vector.broadcast %55 : vector<8x1x32xf32> to vector<8x8x32xf32>
    %58 = vector.broadcast %56 : vector<1x8x32xf32> to vector<8x8x32xf32>
    %59 = arith.mulf %57, %58 : vector<8x8x32xf32>
    %cst_29 = arith.constant dense<0.000000e+00> : vector<8x8x32xf32>
    %60 = tpu.matmul %54, %49, %cst_29 {dimension_numbers = #tpu.dot_dimension_numbers<[2], [0], [0, 1], [1], [0, 0, 0, 1, 1, 1], [], []>, precision = #tpu.contract_precision<fp32>} : vector<8x8x32xf32>, vector<32x32xf32>, vector<8x8x32xf32> -> vector<8x8x32xf32>
    %cst_30 = arith.constant dense<0.000000e+00> : vector<8x8x8xf32>
    %61 = tpu.matmul %60, %59, %cst_30 {dimension_numbers = #tpu.dot_dimension_numbers<[2], [2], [1], [1], [0, 0, 0, 1, 1, 1], [0], [0]>, precision = #tpu.contract_precision<fp32>} : vector<8x8x32xf32>, vector<8x8x32xf32>, vector<8x8x8xf32> -> vector<8x8x8xf32>
    %62 = arith.negf %61 : vector<8x8x8xf32>
    %63 = math.exp %62 : vector<8x8x8xf32>
    %cst_31 = arith.constant 1.000000e+00 : f32
    %64 = vector.broadcast %cst_31 : f32 to vector<8x8x8xf32>
    %65 = arith.addf %64, %63 : vector<8x8x8xf32>
    %66 = arith.divf %64, %65 : vector<8x8x8xf32>
    %c0_32 = arith.constant 0 : index
    %c0_33 = arith.constant 0 : index
    %c0_34 = arith.constant 0 : index
    %67 = vector.load %arg6[%c0_32, %c0_33, %c0_34] : memref<8x8x8xf32, #tpu.memory_space<vmem>>, vector<8x8x8xf32>
    tpu.vector_store %arg6[%c0_32, %c0_33, %c0_34], %66 {strides = array<i32>} : memref<8x8x8xf32, #tpu.memory_space<vmem>>, vector<8x8x8xf32>,
    return
  }
}

</mosaic_0001>

<bundles_post_ra>
// kernel: simulate_adj_forward.1
= control target key start
LH: loop header
LB: loop body
LE: loop exit
PB: predicated region body
PF: predicated region fallthrough
CT: control target
= control target key end

     0   :  { %vm35_vm0 = vcmask 1041408   ;;  %vm31_vm1 = vcmask 80896   ;;  %s4719_s0 = inlined_call_operand.vmem [shape: f32[8,10], index: 0, kind: input, shape index: {}]   ;;  %s4720_s1 = inlined_call_operand.vmem [shape: f32[10,64], index: 1, kind: input, shape index: {}]   ;;  %s4721_s2 = inlined_call_operand.vmem [shape: f32[1,64], index: 2, kind: input, shape index: {}]   ;;  %s4722_s3 = inlined_call_operand.vmem [shape: f32[64,64], index: 3, kind: input, shape index: {}]   ;;  %s4723_s4 = inlined_call_operand.vmem [shape: f32[8,32], index: 4, kind: input, shape index: {}]   ;;  %s4724_s5 = inlined_call_operand.vmem [shape: f32[32,32], index: 5, kind: input, shape index: {}]   ;;  %s4725_s6 = inlined_call_operand.hbm [shape: f32[8,8,8], index: 6, kind: output, shape index: {}]  }
   0x1   :  { %v26_v0 = vld [vmem:[%s4720_s1 + $0x8] sm:$0x3]  ;;  %v25_v1 = vld [vmem:[%s4720_s1] sm:$0xff] }
   0x2   :  { %v24_v2 = vld [vmem:[%s4719_s0] sm:$0xff]  ;;  %v37_v3 = vsel %vm35_vm0, %v26_v0, 0  ;;  %v55_v4 = vand.u32 4294901760, %v25_v1 }
   0x3   :  { %v33_v5 = vsel %vm31_vm1, %v24_v2, 0  ;;  %v53_v6 = vand.u32 4294901760, %v37_v3 }
   0x4   :  { %v57_v7 = vand.u32 4294901760, %v33_v5 }
   0x5   :  { %11 = vsyncpa [#allocation4], 0  ;;  %v87_v8 = vsub.f32 %v25_v1, %v55_v4  ;;  %v81_v9 = vsub.f32 %v37_v3, %v53_v6  ;;  %54 = vmatpush.msra.mxu0 %v53_v6  ;;  %138 = vmatpush.msra.mxu3 %v53_v6  ;;  %v205_v20 = vld [vmem:[%s4722_s3 + $0x38] sm:$0xff]  ;;  %v204_v22 = vld [vmem:[%s4722_s3 + $0x30] sm:$0xff]  ;;  %vm207_vm2 = vcmask 516096   ;;  %vm209_vm3 = vcmask 523264  }
   0x6   :  { %v58_v10 = vsub.f32 %v33_v5, %v57_v7  ;;  %v3973_v21 = vand.u32 4294901760, %v205_v20  ;;  %v3981_v24 = vand.u32 4294901760, %v204_v22  ;;  %v203_v25 = vld [vmem:[%s4722_s3 + $0x28] sm:$0xff]  ;;  %v202_v29 = vld [vmem:[%s4722_s3 + $0x20] sm:$0xff]  ;;  %v201_v34 = vld [vmem:[%s4722_s3 + $0x18] sm:$0xff]  ;;  %vm455_vm4 = vcmask 517121  }
   0x7   :  { %v88_v11 = vand.u32 4294901760, %v87_v8  ;;  %113 = vmatpush.msra.mxu2 %v81_v9  ;;  %56 = vmatpush.msra.mxu0 %v55_v4  ;;  %v82_v12 = vand.u32 4294901760, %v81_v9  ;;  %v3994_v28 = vand.u32 4294901760, %v203_v25  ;;  %v4010_v33 = vand.u32 4294901760, %v202_v29  ;;  %v200_v40 = vld [vmem:[%s4722_s3 + $0x10] sm:$0xff]  ;;  %v199_v46 = vld [vmem:[%s4722_s3 + $0x8] sm:$0xff] }
   0x8   :  { %v59_v13 = vand.u32 4294901760, %v58_v10  ;;  %140 = vmatpush.msra.mxu3 %v55_v4  ;;  %v3979_v23 = vsub.f32 %v205_v20, %v3973_v21  ;;  %v3992_v27 = vsub.f32 %v204_v22, %v3981_v24  ;;  %v4030_v39 = vand.u32 4294901760, %v201_v34  ;;  %v198_v52 = vld [vmem:[%s4722_s3] sm:$0xff]  ;;  %s3921_s19 = smov 32   ;;  %s3923_s0 = smov [#allocation3]  }
   0x9   :  { %v89_v14 = vsub.f32 %v87_v8, %v88_v11  ;;  %116 = vmatpush.msra.mxu2 %v87_v8  ;;  %v83_v15 = vsub.f32 %v81_v9, %v82_v12  ;;  %165 = vmatpush.msrb.mxu0 %v82_v12  ;;  %v4008_v32 = vsub.f32 %v203_v25, %v3994_v28  ;;  %v4044_v44 = vand.u32 4294901760, %v200_v40  ;;  %s3819_s1 = sshll.u32 %s3923_s0, 4  ;;  %s3821_s29 = sshll.u32 %s4725_s6, 4  ;;  %s3820_s1 = int_to_ptr.vmem [resolvable:$true] %s3819_s1  ;;  %s3822_s29 = int_to_ptr.hbm [resolvable:$true] %s3821_s29 }
   0xa   :  { %v60_v16 = vsub.f32 %v58_v10, %v59_v13  ;;  %144 = vmatmul.f32.vlgmr.msra.gmra.mxu3 %v59_v13  ;;  %119 = vmatmul.f32.vlgmr.msra.gmra.mxu2 %v58_v10  ;;  %v3989_v26 = vand.u32 4294901760, %v3979_v23  ;;  %v4005_v31 = vand.u32 4294901760, %v3992_v27  ;;  %v4026_v38 = vsub.f32 %v202_v29, %v4010_v33  ;;  %s3924_s30 = smov 128   ;;  %s3925_s7 = smov 8  }
   0xb   :  { %v84_v17 = vand.u32 4294901760, %v83_v15  ;;  %v90_v19 = vand.u32 4294901760, %v89_v14  ;;  %169 = vmatpush.msrb.mxu0 %v88_v11  ;;  %222 = vmatpush.msrb.mxu2 %v3973_v21  ;;  %v4023_v37 = vand.u32 4294901760, %v4008_v32  ;;  %v4048_v45 = vsub.f32 %v201_v34, %v4030_v39 }
   0xc   :  { %v61_v18 = vand.u32 4294901760, %v60_v16  ;;  %v257_v30 = vsub.f32 %v3979_v23, %v3989_v26  ;;  %v263_v36 = vsub.f32 %v3992_v27, %v4005_v31  ;;  %v4042_v43 = vand.u32 4294901760, %v4026_v38 }
   0xd   :  { %85 = vmatpush.msra.mxu1 %v84_v17  ;;  %224 = vmatpush.msrb.mxu2 %v3981_v24  ;;  %v269_v42 = vsub.f32 %v4008_v32, %v4023_v37  ;;  %v4061_v49 = vsub.f32 %v200_v40, %v4044_v44  ;;  %v4063_v50 = vand.u32 4294901760, %v199_v46  ;;  %v4066_v51 = vand.u32 4294901760, %v4048_v45 }
   0xe   :  { %62 = vmatmul.f32.vlgmr.msra.gmra.mxu0 %v61_v18  ;;  %v4018_v35 = vand.u32 4294901760, %v257_v30  ;;  %v4037_v41 = vand.u32 4294901760, %v263_v36  ;;  %v275_v48 = vsub.f32 %v4026_v38, %v4042_v43  ;;  %v4082_v56 = vand.u32 4294901760, %v198_v52 }
   0xf   :  { %91 = vmatpush.msra.mxu1 %v90_v19  ;;  %317 = vmatpush.msra.mxu0 %v3979_v23  ;;  %v4056_v47 = vand.u32 4294901760, %v269_v42  ;;  %v4077_v54 = vand.u32 4294901760, %v4061_v49  ;;  %v4080_v55 = vsub.f32 %v199_v46, %v4063_v50  ;;  %v281_v57 = vsub.f32 %v4048_v45, %v4066_v51 }
  0x10   :  { %93 = vmatmul.f32.vlgmr.msra.gmra.mxu1 %v57_v7  ;;  %226 = vmatpush.msrb.mxu2 %v3994_v28  ;;  %v4074_v53 = vand.u32 4294901760, %v275_v48  ;;  %v4096_v60 = vsub.f32 %v198_v52, %v4082_v56  ;;  %vm703_vm5 = vcmask 518146   ;;  %vm951_vm6 = vcmask 519171  }
  0x11   :  { %190 = vmatpush.msrb.mxu1 %v53_v6  ;;  %320 = vmatpush.msra.mxu0 %v3992_v27  ;;  %v287_v58 = vsub.f32 %v4061_v49, %v4077_v54  ;;  %v4093_v59 = vand.u32 4294901760, %v4080_v55  ;;  %v4099_v61 = vand.u32 4294901760, %v281_v57  ;;  %vm1199_vm7 = vcmask 520196  }
  0x12   :  { %228 = vmatpush.msrb.mxu2 %v4010_v33  ;;  %259 = vmatpush.msrb.mxu3 %v4018_v35  ;;  %v4108_v0 = vand.u32 4294901760, %v4096_v60  ;;  %vm1447_vm8 = vcmask 521221   ;;  %vm1695_vm9 = vcmask 522246   ;;  %vm1943_vm10 = vcmask 523271  }
  0x13   :  { %192 = vmatpush.msrb.mxu1 %v55_v4  ;;  %323 = vmatpush.msra.mxu0 %v4008_v32  ;;  %v4103_v62 = vand.u32 4294901760, %v287_v58  ;;  %v293_v63 = vsub.f32 %v4080_v55, %v4093_v59  ;;  %v3846_v4 = vld [vmem:[%s4721_s2] ss:$0 sm:$0xff]  ;;  %vm1995_vm11 = vcmask 261120   ;;  %vm3806_vm15 = vcmask 64512  }
  0x14   :  { %230 = vmatpush.msrb.mxu2 %v4030_v39  ;;  %265 = vmatpush.msrb.mxu3 %v4037_v41  ;;  %v299_v2 = vsub.f32 %v4096_v60, %v4108_v0 }
  0x15   :  { %354 = vmatpush.msra.mxu1 %v3973_v21  ;;  %326 = vmatpush.msra.mxu0 %v4026_v38  ;;  %v4114_v1 = vand.u32 4294901760, %v293_v63 }
  0x16   :  { %171 = vmatmul.f32.vlgmr.msrb.gmra.mxu0 %v57_v7  ;;  %232 = vmatpush.msrb.mxu2 %v4044_v44  ;;  %v4122_v3 = vand.u32 4294901760, %v299_v2 }
  0x17   :  { %356 = vmatpush.msra.mxu1 %v3981_v24  ;;  %329 = vmatpush.msra.mxu0 %v4048_v45 }
  0x18   :  { %194 = vmatmul.f32.vlgmr.msrb.gmra.mxu1 %v57_v7  ;;  %271 = vmatpush.msrb.mxu3 %v4056_v47 }
  0x19   :  { %358 = vmatpush.msra.mxu1 %v3994_v28  ;;  %332 = vmatpush.msra.mxu0 %v4061_v49 }
  0x1a   :  { %234 = vmatpush.msrb.mxu2 %v4063_v50  ;;  %277 = vmatpush.msrb.mxu3 %v4074_v53 }
  0x1b   :  { %360 = vmatpush.msra.mxu1 %v4010_v33  ;;  %335 = vmatpush.msra.mxu0 %v4080_v55 }
  0x1c   :  { %236 = vmatpush.msrb.mxu2 %v4082_v56  ;;  %283 = vmatpush.msrb.mxu3 %v4099_v61 }
  0x1d   :  { %362 = vmatpush.msra.mxu1 %v4030_v39  ;;  %338 = vmatpush.msra.mxu0 %v4096_v60 }
  0x1e   :  { %387 = vmatpush.msra.mxu2 %v3989_v26  ;;  %289 = vmatpush.msrb.mxu3 %v4103_v62 }
  0x1f   :  { %364 = vmatpush.msra.mxu1 %v4044_v44  ;;  %470 = vmatpush.msrb.mxu0 %v3973_v21 }
  0x20   :  { %391 = vmatpush.msra.mxu2 %v4005_v31  ;;  %295 = vmatpush.msrb.mxu3 %v4114_v1 }
  0x21   :  { %366 = vmatpush.msra.mxu1 %v4063_v50  ;;  %472 = vmatpush.msrb.mxu0 %v3981_v24 }
  0x22   :  { %395 = vmatpush.msra.mxu2 %v4023_v37  ;;  %301 = vmatpush.msrb.mxu3 %v4122_v3 }
  0x23   :  { %368 = vmatpush.msra.mxu1 %v4082_v56  ;;  %474 = vmatpush.msrb.mxu0 %v3994_v28 }
  0x24   :  { %399 = vmatpush.msra.mxu2 %v4042_v43  ;;  %430 = vmatpush.msra.mxu3 %v3973_v21 }
  0x25   :  { %507 = vmatpush.msrb.mxu1 %v4018_v35  ;;  %476 = vmatpush.msrb.mxu0 %v4010_v33 }
  0x26   :  { %403 = vmatpush.msra.mxu2 %v4066_v51  ;;  %432 = vmatpush.msra.mxu3 %v3981_v24 }
  0x27   :  { %513 = vmatpush.msrb.mxu1 %v4037_v41  ;;  %478 = vmatpush.msrb.mxu0 %v4030_v39 }
  0x28   :  { %407 = vmatpush.msra.mxu2 %v4077_v54  ;;  %434 = vmatpush.msra.mxu3 %v3994_v28 }
  0x29   :  { %519 = vmatpush.msrb.mxu1 %v4056_v47  ;;  %480 = vmatpush.msrb.mxu0 %v4044_v44 }
  0x2a   :  { %411 = vmatpush.msra.mxu2 %v4093_v59  ;;  %436 = vmatpush.msra.mxu3 %v4010_v33 }
  0x2b   :  { %525 = vmatpush.msrb.mxu1 %v4074_v53  ;;  %482 = vmatpush.msrb.mxu0 %v4063_v50 }
  0x2c   :  { %415 = vmatpush.msra.mxu2 %v4108_v0  ;;  %438 = vmatpush.msra.mxu3 %v4030_v39 }
  0x2d   :  { %531 = vmatpush.msrb.mxu1 %v4099_v61  ;;  %484 = vmatpush.msrb.mxu0 %v4082_v56 }
  0x2e   :  { %440 = vmatpush.msra.mxu3 %v4044_v44 }
  0x2f   :  { %537 = vmatpush.msrb.mxu1 %v4103_v62 }
  0x30   :  { %442 = vmatpush.msra.mxu3 %v4063_v50 }
  0x31   :  { %543 = vmatpush.msrb.mxu1 %v4114_v1 }
  0x32   :  { %444 = vmatpush.msra.mxu3 %v4082_v56 }
  0x33   :  { %549 = vmatpush.msrb.mxu1 %v4122_v3 }
  0x8b   :  { %v63_v5 = vpop.f32.mrf.mxu0 }
  0x8c   :  { %v64_v6 = vadd.f32 %v3846_v4, %v63_v5 }
  0x8d   :  { %v94_v7 = vpop.f32.mrf.mxu1  ;;  %v120_v8 = vpop.f32.mrf.mxu2 }
  0x8e   :  { %v95_v9 = vadd.f32 %v94_v7, %v64_v6  ;;  %v145_v10 = vpop.f32.mrf.mxu3 }
  0x90   :  { %v121_v11 = vadd.f32 %v120_v8, %v95_v9 }
  0x92   :  { %v146_v12 = vadd.f32 %v145_v10, %v121_v11 }
  0x93   :  { %v172_v13 = vpop.f32.mrf.mxu0 }
  0x94   :  { %v173_v14 = vadd.f32 %v172_v13, %v146_v12 }
  0x95   :  { %v195_v15 = vpop.f32.mrf.mxu1 }
  0x96   :  { %v4157_v16 = vadd.f32 %v195_v15, %v173_v14 }
  0x98   :  { %3847 = vtanh.f32 %v4157_v16 }
  0x9e   :  { %v3848_v17 = vpop.eup %3847 }
  0x9f   :  { %208 = vst.msk [vmem:[#allocation2] sm:$0x1] %vm207_vm2, %v3848_v17  ;;  %v211_v18 = vsel %vm209_vm3, %v3848_v17, 0 }
  0xa0   :  { %v237_v19 = vand.u32 4294901760, %v211_v18 }
  0xa2   :  { %303 = vmatmul.f32.vlgmr.msrb.gmra.mxu3 %v237_v19  ;;  %v238_v20 = vsub.f32 %v211_v18, %v237_v19 }
  0xa3   :  { %602 = vmatpush.msrb.mxu3 %v3973_v21 }
  0xa4   :  { %341 = vmatmul.f32.vlgmr.msra.gmra.mxu0 %v238_v20  ;;  %v239_v22 = vand.u32 4294901760, %v238_v20 }
  0xa5   :  { %604 = vmatpush.msrb.mxu3 %v3981_v24  ;;  %635 = vmatpush.msra.mxu0 %v3989_v26 }
  0xa6   :  { %372 = vmatmul.f32.vlgmr.msra.gmra.mxu1 %v239_v22  ;;  %v240_v25 = vsub.f32 %v238_v20, %v239_v22 }
  0xa7   :  { %606 = vmatpush.msrb.mxu3 %v3994_v28  ;;  %678 = vmatpush.msra.mxu1 %v3973_v21 }
  0xa8   :  { %v241_v29 = vand.u32 4294901760, %v240_v25  ;;  %639 = vmatpush.msra.mxu0 %v4005_v31 }
  0xa9   :  { %608 = vmatpush.msrb.mxu3 %v4010_v33  ;;  %680 = vmatpush.msra.mxu1 %v3981_v24 }
  0xaa   :  { %242 = vmatmul.f32.vlgmr.msrb.gmra.mxu2 %v241_v29  ;;  %446 = vmatmul.f32.vlgmr.msra.gmra.mxu3 %v237_v19 }
  0xab   :  { %565 = vmatpush.msrb.mxu2 %v3979_v23  ;;  %610 = vmatpush.msrb.mxu3 %v4030_v39 }
  0xac   :  { %682 = vmatpush.msra.mxu1 %v3994_v28  ;;  %643 = vmatpush.msra.mxu0 %v4023_v37 }
  0xad   :  { %568 = vmatpush.msrb.mxu2 %v3992_v27  ;;  %612 = vmatpush.msrb.mxu3 %v4044_v44 }
  0xae   :  { %684 = vmatpush.msra.mxu1 %v4010_v33  ;;  %647 = vmatpush.msra.mxu0 %v4042_v43 }
  0xaf   :  { %571 = vmatpush.msrb.mxu2 %v4008_v32  ;;  %614 = vmatpush.msrb.mxu3 %v4063_v50 }
  0xb0   :  { %686 = vmatpush.msra.mxu1 %v4030_v39  ;;  %651 = vmatpush.msra.mxu0 %v4066_v51 }
  0xb1   :  { %574 = vmatpush.msrb.mxu2 %v4026_v38  ;;  %616 = vmatpush.msrb.mxu3 %v4082_v56 }
  0xb2   :  { %417 = vmatmul.f32.vlgmr.msra.gmra.mxu2 %v237_v19  ;;  %688 = vmatpush.msra.mxu1 %v4044_v44 }
  0xb3   :  { %577 = vmatpush.msrb.mxu2 %v4048_v45  ;;  %655 = vmatpush.msra.mxu0 %v4077_v54 }
  0xb4   :  { %690 = vmatpush.msra.mxu1 %v4063_v50  ;;  %755 = vmatpush.msra.mxu3 %v4018_v35 }
  0xb5   :  { %580 = vmatpush.msrb.mxu2 %v4061_v49  ;;  %659 = vmatpush.msra.mxu0 %v4093_v59 }
  0xb6   :  { %692 = vmatpush.msra.mxu1 %v4082_v56  ;;  %761 = vmatpush.msra.mxu3 %v4037_v41 }
  0xb7   :  { %583 = vmatpush.msrb.mxu2 %v4080_v55  ;;  %663 = vmatpush.msra.mxu0 %v4108_v0 }
  0xb8   :  { %767 = vmatpush.msra.mxu3 %v4056_v47 }
  0xb9   :  { %586 = vmatpush.msrb.mxu2 %v4096_v60 }
  0xba   :  { %773 = vmatpush.msra.mxu3 %v4074_v53 }
  0xbb   :  { %718 = vmatpush.msra.mxu2 %v3973_v21 }
  0xbc   :  { %779 = vmatpush.msra.mxu3 %v4099_v61 }
  0xbd   :  { %720 = vmatpush.msra.mxu2 %v3981_v24 }
  0xbe   :  { %785 = vmatpush.msra.mxu3 %v4103_v62 }
  0xbf   :  { %722 = vmatpush.msra.mxu2 %v3994_v28 }
  0xc0   :  { %791 = vmatpush.msra.mxu3 %v4114_v1 }
  0xc1   :  { %724 = vmatpush.msra.mxu2 %v4010_v33 }
  0xc2   :  { %797 = vmatpush.msra.mxu3 %v4122_v3 }
  0xc3   :  { %726 = vmatpush.msra.mxu2 %v4030_v39 }
  0xc5   :  { %728 = vmatpush.msra.mxu2 %v4044_v44 }
  0xc7   :  { %730 = vmatpush.msra.mxu2 %v4063_v50 }
  0xc9   :  { %732 = vmatpush.msra.mxu2 %v4082_v56 }
 0x121   :  { %v342_v40 = vpop.f32.mrf.mxu0 }
 0x123   :  { %v373_v46 = vpop.f32.mrf.mxu1 }
 0x125   :  { %v304_v30 = vpop.f32.mrf.mxu3 }
 0x12d   :  { %v243_v34 = vpop.f32.mrf.mxu2  ;;  %v447_v58 = vpop.f32.mrf.mxu3 }
 0x12e   :  { %v305_v36 = vadd.f32 %v304_v30, %v243_v34 }
 0x130   :  { %v343_v42 = vadd.f32 %v342_v40, %v305_v36 }
 0x132   :  { %v374_v48 = vadd.f32 %v373_v46, %v343_v42 }
 0x135   :  { %v418_v52 = vpop.f32.mrf.mxu2 }
 0x136   :  { %v419_v57 = vadd.f32 %v418_v52, %v374_v48 }
 0x138   :  { %v448_v63 = vadd.f32 %v447_v58, %v419_v57 }
 0x13a   :  { %v451_v2 = vrot.slane %v448_v63, 7 }
 0x13c   :  { %v453_v4 = vadd.f32 %v451_v2, %v4157_v16 }
 0x13e   :  { %3849 = vtanh.f32 %v453_v4 }
 0x144   :  { %v3850_v5 = vpop.eup %3849 }
 0x145   :  { %456 = vst.msk [vmem:[#allocation2] sm:$0x2] %vm455_vm4, %v3850_v5  ;;  %v458_v6 = vrot.slane %v3850_v5, 1 }
 0x147   :  { %v459_v7 = vsel %vm209_vm3, %v458_v6, 0 }
 0x148   :  { %v485_v8 = vand.u32 4294901760, %v459_v7 }
 0x14a   :  { %551 = vmatmul.f32.vlgmr.msrb.gmra.mxu1 %v485_v8  ;;  %v486_v9 = vsub.f32 %v459_v7, %v485_v8 }
 0x14b   :  { %850 = vmatpush.msrb.mxu1 %v3973_v21 }
 0x14c   :  { %589 = vmatmul.f32.vlgmr.msrb.gmra.mxu2 %v486_v9  ;;  %v487_v10 = vand.u32 4294901760, %v486_v9 }
 0x14d   :  { %852 = vmatpush.msrb.mxu1 %v3981_v24  ;;  %883 = vmatpush.msrb.mxu2 %v3989_v26 }
 0x14e   :  { %620 = vmatmul.f32.vlgmr.msrb.gmra.mxu3 %v487_v10  ;;  %v488_v11 = vsub.f32 %v486_v9, %v487_v10 }
 0x14f   :  { %854 = vmatpush.msrb.mxu1 %v3994_v28  ;;  %926 = vmatpush.msrb.mxu3 %v3973_v21 }
 0x150   :  { %v489_v12 = vand.u32 4294901760, %v488_v11  ;;  %887 = vmatpush.msrb.mxu2 %v4005_v31 }
 0x151   :  { %856 = vmatpush.msrb.mxu1 %v4010_v33  ;;  %928 = vmatpush.msrb.mxu3 %v3981_v24 }
 0x152   :  { %490 = vmatmul.f32.vlgmr.msrb.gmra.mxu0 %v489_v12  ;;  %694 = vmatmul.f32.vlgmr.msra.gmra.mxu1 %v485_v8 }
 0x153   :  { %813 = vmatpush.msrb.mxu0 %v3979_v23  ;;  %858 = vmatpush.msrb.mxu1 %v4030_v39 }
 0x154   :  { %930 = vmatpush.msrb.mxu3 %v3994_v28  ;;  %891 = vmatpush.msrb.mxu2 %v4023_v37 }
 0x155   :  { %816 = vmatpush.msrb.mxu0 %v3992_v27  ;;  %860 = vmatpush.msrb.mxu1 %v4044_v44 }
 0x156   :  { %932 = vmatpush.msrb.mxu3 %v4010_v33  ;;  %895 = vmatpush.msrb.mxu2 %v4042_v43 }
 0x157   :  { %819 = vmatpush.msrb.mxu0 %v4008_v32  ;;  %862 = vmatpush.msrb.mxu1 %v4063_v50 }
 0x158   :  { %934 = vmatpush.msrb.mxu3 %v4030_v39  ;;  %899 = vmatpush.msrb.mxu2 %v4066_v51 }
 0x159   :  { %822 = vmatpush.msrb.mxu0 %v4026_v38  ;;  %864 = vmatpush.msrb.mxu1 %v4082_v56 }
 0x15a   :  { %665 = vmatmul.f32.vlgmr.msra.gmra.mxu0 %v485_v8  ;;  %936 = vmatpush.msrb.mxu3 %v4044_v44 }
 0x15b   :  { %825 = vmatpush.msrb.mxu0 %v4048_v45  ;;  %903 = vmatpush.msrb.mxu2 %v4077_v54 }
 0x15c   :  { %938 = vmatpush.msrb.mxu3 %v4063_v50  ;;  %1003 = vmatpush.msra.mxu1 %v4018_v35 }
 0x15d   :  { %828 = vmatpush.msrb.mxu0 %v4061_v49  ;;  %907 = vmatpush.msrb.mxu2 %v4093_v59 }
 0x15e   :  { %940 = vmatpush.msrb.mxu3 %v4082_v56  ;;  %1009 = vmatpush.msra.mxu1 %v4037_v41 }
 0x15f   :  { %831 = vmatpush.msrb.mxu0 %v4080_v55  ;;  %911 = vmatpush.msrb.mxu2 %v4108_v0 }
 0x160   :  { %1015 = vmatpush.msra.mxu1 %v4056_v47 }
 0x161   :  { %834 = vmatpush.msrb.mxu0 %v4096_v60 }
 0x162   :  { %1021 = vmatpush.msra.mxu1 %v4074_v53 }
 0x163   :  { %966 = vmatpush.msra.mxu0 %v3973_v21 }
 0x164   :  { %1027 = vmatpush.msra.mxu1 %v4099_v61 }
 0x165   :  { %968 = vmatpush.msra.mxu0 %v3981_v24 }
 0x166   :  { %1033 = vmatpush.msra.mxu1 %v4103_v62 }
 0x167   :  { %970 = vmatpush.msra.mxu0 %v3994_v28 }
 0x168   :  { %1039 = vmatpush.msra.mxu1 %v4114_v1 }
 0x169   :  { %972 = vmatpush.msra.mxu0 %v4010_v33 }
 0x16a   :  { %1045 = vmatpush.msra.mxu1 %v4122_v3 }
 0x16b   :  { %974 = vmatpush.msra.mxu0 %v4030_v39 }
 0x16d   :  { %976 = vmatpush.msra.mxu0 %v4044_v44 }
 0x16f   :  { %978 = vmatpush.msra.mxu0 %v4063_v50 }
 0x171   :  { %980 = vmatpush.msra.mxu0 %v4082_v56 }
 0x1c7   :  { %v552_v13 = vpop.f32.mrf.mxu1 }
 0x1cf   :  { %v491_v14 = vpop.f32.mrf.mxu0  ;;  %v590_v17 = vpop.f32.mrf.mxu2 }
 0x1d0   :  { %v553_v15 = vadd.f32 %v552_v13, %v491_v14  ;;  %v695_v29 = vpop.f32.mrf.mxu1 }
 0x1d1   :  { %v621_v19 = vpop.f32.mrf.mxu3 }
 0x1d2   :  { %v591_v18 = vadd.f32 %v590_v17, %v553_v15 }
 0x1d4   :  { %v622_v20 = vadd.f32 %v621_v19, %v591_v18 }
 0x1d7   :  { %v666_v22 = vpop.f32.mrf.mxu0 }
 0x1d8   :  { %v667_v25 = vadd.f32 %v666_v22, %v622_v20 }
 0x1da   :  { %v696_v30 = vadd.f32 %v695_v29, %v667_v25 }
 0x1dc   :  { %v699_v34 = vrot.slane %v696_v30, 6 }
 0x1de   :  { %v701_v36 = vadd.f32 %v699_v34, %v4157_v16 }
 0x1e0   :  { %3851 = vtanh.f32 %v701_v36 }
 0x1e6   :  { %v3852_v40 = vpop.eup %3851 }
 0x1e7   :  { %704 = vst.msk [vmem:[#allocation2] sm:$0x4] %vm703_vm5, %v3852_v40  ;;  %v706_v42 = vrot.slane %v3852_v40, 2 }
 0x1e9   :  { %v707_v46 = vsel %vm209_vm3, %v706_v42, 0 }
 0x1ea   :  { %v733_v48 = vand.u32 4294901760, %v707_v46 }
 0x1ec   :  { %799 = vmatmul.f32.vlgmr.msra.gmra.mxu3 %v733_v48  ;;  %v734_v52 = vsub.f32 %v707_v46, %v733_v48 }
 0x1ed   :  { %1098 = vmatpush.msra.mxu3 %v3973_v21 }
 0x1ee   :  { %837 = vmatmul.f32.vlgmr.msrb.gmra.mxu0 %v734_v52  ;;  %v735_v57 = vand.u32 4294901760, %v734_v52 }
 0x1ef   :  { %1100 = vmatpush.msra.mxu3 %v3981_v24  ;;  %1131 = vmatpush.msrb.mxu0 %v3989_v26 }
 0x1f0   :  { %868 = vmatmul.f32.vlgmr.msrb.gmra.mxu1 %v735_v57  ;;  %v736_v58 = vsub.f32 %v734_v52, %v735_v57 }
 0x1f1   :  { %1102 = vmatpush.msra.mxu3 %v3994_v28  ;;  %1174 = vmatpush.msrb.mxu1 %v3973_v21 }
 0x1f2   :  { %v737_v63 = vand.u32 4294901760, %v736_v58  ;;  %1135 = vmatpush.msrb.mxu0 %v4005_v31 }
 0x1f3   :  { %1104 = vmatpush.msra.mxu3 %v4010_v33  ;;  %1176 = vmatpush.msrb.mxu1 %v3981_v24 }
 0x1f4   :  { %738 = vmatmul.f32.vlgmr.msra.gmra.mxu2 %v737_v63  ;;  %942 = vmatmul.f32.vlgmr.msrb.gmra.mxu3 %v733_v48 }
 0x1f5   :  { %1061 = vmatpush.msra.mxu2 %v3979_v23  ;;  %1106 = vmatpush.msra.mxu3 %v4030_v39 }
 0x1f6   :  { %1178 = vmatpush.msrb.mxu1 %v3994_v28  ;;  %1139 = vmatpush.msrb.mxu0 %v4023_v37 }
 0x1f7   :  { %1064 = vmatpush.msra.mxu2 %v3992_v27  ;;  %1108 = vmatpush.msra.mxu3 %v4044_v44 }
 0x1f8   :  { %1180 = vmatpush.msrb.mxu1 %v4010_v33  ;;  %1143 = vmatpush.msrb.mxu0 %v4042_v43 }
 0x1f9   :  { %1067 = vmatpush.msra.mxu2 %v4008_v32  ;;  %1110 = vmatpush.msra.mxu3 %v4063_v50 }
 0x1fa   :  { %1182 = vmatpush.msrb.mxu1 %v4030_v39  ;;  %1147 = vmatpush.msrb.mxu0 %v4066_v51 }
 0x1fb   :  { %1070 = vmatpush.msra.mxu2 %v4026_v38  ;;  %1112 = vmatpush.msra.mxu3 %v4082_v56 }
 0x1fc   :  { %913 = vmatmul.f32.vlgmr.msrb.gmra.mxu2 %v733_v48  ;;  %1184 = vmatpush.msrb.mxu1 %v4044_v44 }
 0x1fd   :  { %1073 = vmatpush.msra.mxu2 %v4048_v45  ;;  %1151 = vmatpush.msrb.mxu0 %v4077_v54 }
 0x1fe   :  { %1186 = vmatpush.msrb.mxu1 %v4063_v50  ;;  %1251 = vmatpush.msrb.mxu3 %v4018_v35 }
 0x1ff   :  { %1076 = vmatpush.msra.mxu2 %v4061_v49  ;;  %1155 = vmatpush.msrb.mxu0 %v4093_v59 }
 0x200   :  { %1188 = vmatpush.msrb.mxu1 %v4082_v56  ;;  %1257 = vmatpush.msrb.mxu3 %v4037_v41 }
 0x201   :  { %1079 = vmatpush.msra.mxu2 %v4080_v55  ;;  %1159 = vmatpush.msrb.mxu0 %v4108_v0 }
 0x202   :  { %1263 = vmatpush.msrb.mxu3 %v4056_v47 }
 0x203   :  { %1082 = vmatpush.msra.mxu2 %v4096_v60 }
 0x204   :  { %1269 = vmatpush.msrb.mxu3 %v4074_v53 }
 0x205   :  { %1214 = vmatpush.msrb.mxu2 %v3973_v21 }
 0x206   :  { %1275 = vmatpush.msrb.mxu3 %v4099_v61 }
 0x207   :  { %1216 = vmatpush.msrb.mxu2 %v3981_v24 }
 0x208   :  { %1281 = vmatpush.msrb.mxu3 %v4103_v62 }
 0x209   :  { %1218 = vmatpush.msrb.mxu2 %v3994_v28 }
 0x20a   :  { %1287 = vmatpush.msrb.mxu3 %v4114_v1 }
 0x20b   :  { %1220 = vmatpush.msrb.mxu2 %v4010_v33 }
 0x20c   :  { %1293 = vmatpush.msrb.mxu3 %v4122_v3 }
 0x20d   :  { %1222 = vmatpush.msrb.mxu2 %v4030_v39 }
 0x20f   :  { %1224 = vmatpush.msrb.mxu2 %v4044_v44 }
 0x211   :  { %1226 = vmatpush.msrb.mxu2 %v4063_v50 }
 0x213   :  { %1228 = vmatpush.msrb.mxu2 %v4082_v56 }
 0x26b   :  { %v838_v6 = vpop.f32.mrf.mxu0 }
 0x26d   :  { %v869_v8 = vpop.f32.mrf.mxu1 }
 0x26f   :  { %v800_v2 = vpop.f32.mrf.mxu3 }
 0x277   :  { %v739_v4 = vpop.f32.mrf.mxu2  ;;  %v943_v12 = vpop.f32.mrf.mxu3 }
 0x278   :  { %v801_v5 = vadd.f32 %v800_v2, %v739_v4 }
 0x27a   :  { %v839_v7 = vadd.f32 %v838_v6, %v801_v5 }
 0x27c   :  { %v870_v9 = vadd.f32 %v869_v8, %v839_v7 }
 0x27f   :  { %v914_v10 = vpop.f32.mrf.mxu2 }
 0x280   :  { %v915_v11 = vadd.f32 %v914_v10, %v870_v9 }
 0x282   :  { %v944_v13 = vadd.f32 %v943_v12, %v915_v11 }
 0x284   :  { %v947_v14 = vrot.slane %v944_v13, 5 }
 0x286   :  { %v949_v15 = vadd.f32 %v947_v14, %v4157_v16 }
 0x288   :  { %3853 = vtanh.f32 %v949_v15 }
 0x28e   :  { %v3854_v17 = vpop.eup %3853 }
 0x28f   :  { %952 = vst.msk [vmem:[#allocation2] sm:$0x8] %vm951_vm6, %v3854_v17  ;;  %v954_v18 = vrot.slane %v3854_v17, 3 }
 0x291   :  { %v955_v19 = vsel %vm209_vm3, %v954_v18, 0 }
 0x292   :  { %v981_v20 = vand.u32 4294901760, %v955_v19 }
 0x294   :  { %1047 = vmatmul.f32.vlgmr.msra.gmra.mxu1 %v981_v20  ;;  %v982_v22 = vsub.f32 %v955_v19, %v981_v20 }
 0x295   :  { %1346 = vmatpush.msra.mxu1 %v3973_v21 }
 0x296   :  { %1085 = vmatmul.f32.vlgmr.msra.gmra.mxu2 %v982_v22  ;;  %v983_v25 = vand.u32 4294901760, %v982_v22 }
 0x297   :  { %1348 = vmatpush.msra.mxu1 %v3981_v24  ;;  %1379 = vmatpush.msra.mxu2 %v3989_v26 }
 0x298   :  { %1116 = vmatmul.f32.vlgmr.msra.gmra.mxu3 %v983_v25  ;;  %v984_v29 = vsub.f32 %v982_v22, %v983_v25 }
 0x299   :  { %1350 = vmatpush.msra.mxu1 %v3994_v28  ;;  %1422 = vmatpush.msra.mxu3 %v3973_v21 }
 0x29a   :  { %v985_v30 = vand.u32 4294901760, %v984_v29  ;;  %1383 = vmatpush.msra.mxu2 %v4005_v31 }
 0x29b   :  { %1352 = vmatpush.msra.mxu1 %v4010_v33  ;;  %1424 = vmatpush.msra.mxu3 %v3981_v24 }
 0x29c   :  { %986 = vmatmul.f32.vlgmr.msra.gmra.mxu0 %v985_v30  ;;  %1190 = vmatmul.f32.vlgmr.msrb.gmra.mxu1 %v981_v20 }
 0x29d   :  { %1309 = vmatpush.msra.mxu0 %v3979_v23  ;;  %1354 = vmatpush.msra.mxu1 %v4030_v39 }
 0x29e   :  { %1426 = vmatpush.msra.mxu3 %v3994_v28  ;;  %1387 = vmatpush.msra.mxu2 %v4023_v37 }
 0x29f   :  { %1312 = vmatpush.msra.mxu0 %v3992_v27  ;;  %1356 = vmatpush.msra.mxu1 %v4044_v44 }
 0x2a0   :  { %1428 = vmatpush.msra.mxu3 %v4010_v33  ;;  %1391 = vmatpush.msra.mxu2 %v4042_v43 }
 0x2a1   :  { %1315 = vmatpush.msra.mxu0 %v4008_v32  ;;  %1358 = vmatpush.msra.mxu1 %v4063_v50 }
 0x2a2   :  { %1430 = vmatpush.msra.mxu3 %v4030_v39  ;;  %1395 = vmatpush.msra.mxu2 %v4066_v51 }
 0x2a3   :  { %1318 = vmatpush.msra.mxu0 %v4026_v38  ;;  %1360 = vmatpush.msra.mxu1 %v4082_v56 }
 0x2a4   :  { %1161 = vmatmul.f32.vlgmr.msrb.gmra.mxu0 %v981_v20  ;;  %1432 = vmatpush.msra.mxu3 %v4044_v44 }
 0x2a5   :  { %1321 = vmatpush.msra.mxu0 %v4048_v45  ;;  %1399 = vmatpush.msra.mxu2 %v4077_v54 }
 0x2a6   :  { %1434 = vmatpush.msra.mxu3 %v4063_v50  ;;  %1499 = vmatpush.msrb.mxu1 %v4018_v35 }
 0x2a7   :  { %1324 = vmatpush.msra.mxu0 %v4061_v49  ;;  %1403 = vmatpush.msra.mxu2 %v4093_v59 }
 0x2a8   :  { %1436 = vmatpush.msra.mxu3 %v4082_v56  ;;  %1505 = vmatpush.msrb.mxu1 %v4037_v41 }
 0x2a9   :  { %1327 = vmatpush.msra.mxu0 %v4080_v55  ;;  %1407 = vmatpush.msra.mxu2 %v4108_v0 }
 0x2aa   :  { %1511 = vmatpush.msrb.mxu1 %v4056_v47 }
 0x2ab   :  { %1330 = vmatpush.msra.mxu0 %v4096_v60 }
 0x2ac   :  { %1517 = vmatpush.msrb.mxu1 %v4074_v53 }
 0x2ad   :  { %1462 = vmatpush.msrb.mxu0 %v3973_v21 }
 0x2ae   :  { %1523 = vmatpush.msrb.mxu1 %v4099_v61 }
 0x2af   :  { %1464 = vmatpush.msrb.mxu0 %v3981_v24 }
 0x2b0   :  { %1529 = vmatpush.msrb.mxu1 %v4103_v62 }
 0x2b1   :  { %1466 = vmatpush.msrb.mxu0 %v3994_v28 }
 0x2b2   :  { %1535 = vmatpush.msrb.mxu1 %v4114_v1 }
 0x2b3   :  { %1468 = vmatpush.msrb.mxu0 %v4010_v33 }
 0x2b4   :  { %1541 = vmatpush.msrb.mxu1 %v4122_v3 }
 0x2b5   :  { %1470 = vmatpush.msrb.mxu0 %v4030_v39 }
 0x2b7   :  { %1472 = vmatpush.msrb.mxu0 %v4044_v44 }
 0x2b9   :  { %1474 = vmatpush.msrb.mxu0 %v4063_v50 }
 0x2bb   :  { %1476 = vmatpush.msrb.mxu0 %v4082_v56 }
 0x311   :  { %v1048_v34 = vpop.f32.mrf.mxu1 }
 0x319   :  { %v987_v36 = vpop.f32.mrf.mxu0  ;;  %v1086_v42 = vpop.f32.mrf.mxu2 }
 0x31a   :  { %v1049_v40 = vadd.f32 %v1048_v34, %v987_v36  ;;  %v1191_v63 = vpop.f32.mrf.mxu1 }
 0x31b   :  { %v1117_v48 = vpop.f32.mrf.mxu3 }
 0x31c   :  { %v1087_v46 = vadd.f32 %v1086_v42, %v1049_v40  ;;  %v1949_v42 = vld [vmem:[%s4724_s5 + $0x10] sm:$0xff] }
 0x31e   :  { %v1118_v52 = vadd.f32 %v1117_v48, %v1087_v46  ;;  %v1948_v46 = vld [vmem:[%s4724_s5 + $0x8] sm:$0xff] }
 0x321   :  { %v1162_v57 = vpop.f32.mrf.mxu0 }
 0x322   :  { %v1163_v58 = vadd.f32 %v1162_v57, %v1118_v52  ;;  %v2034_v52 = vand.u32 4294901760, %v1949_v42  ;;  %v2036_v57 = vand.u32 4294901760, %v1948_v46 }
 0x324   :  { %v1192_v2 = vadd.f32 %v1191_v63, %v1163_v58  ;;  %v2124_v63 = vsub.f32 %v1949_v42, %v2034_v52 }
 0x326   :  { %v1195_v4 = vrot.slane %v1192_v2, 4  ;;  %v2130_v2 = vsub.f32 %v1948_v46, %v2036_v57 }
 0x328   :  { %v1197_v5 = vadd.f32 %v1195_v4, %v4157_v16  ;;  %v1947_v4 = vld [vmem:[%s4724_s5] sm:$0xff] }
 0x32a   :  { %3855 = vtanh.f32 %v1197_v5 }
 0x330   :  { %v3856_v6 = vpop.eup %3855 }
 0x331   :  { %1200 = vst.msk [vmem:[#allocation2] sm:$0x10] %vm1199_vm7, %v3856_v6  ;;  %v1202_v7 = vrot.slane %v3856_v6, 4  ;;  %v2125_v6 = vand.u32 4294901760, %v2124_v63 }
 0x333   :  { %v1203_v8 = vsel %vm209_vm3, %v1202_v7, 0  ;;  %v2131_v7 = vand.u32 4294901760, %v2130_v2 }
 0x334   :  { %v1229_v9 = vand.u32 4294901760, %v1203_v8 }
 0x336   :  { %1295 = vmatmul.f32.vlgmr.msrb.gmra.mxu3 %v1229_v9  ;;  %v1230_v10 = vsub.f32 %v1203_v8, %v1229_v9  ;;  %v2038_v8 = vand.u32 4294901760, %v1947_v4 }
 0x337   :  { %1594 = vmatpush.msrb.mxu3 %v3973_v21 }
 0x338   :  { %1333 = vmatmul.f32.vlgmr.msra.gmra.mxu0 %v1230_v10  ;;  %v1231_v11 = vand.u32 4294901760, %v1230_v10 }
 0x339   :  { %1596 = vmatpush.msrb.mxu3 %v3981_v24  ;;  %1627 = vmatpush.msra.mxu0 %v3989_v26 }
 0x33a   :  { %1364 = vmatmul.f32.vlgmr.msra.gmra.mxu1 %v1231_v11  ;;  %v1232_v12 = vsub.f32 %v1230_v10, %v1231_v11  ;;  %v2126_v10 = vsub.f32 %v2124_v63, %v2125_v6  ;;  %v2132_v11 = vsub.f32 %v2130_v2, %v2131_v7 }
 0x33b   :  { %1598 = vmatpush.msrb.mxu3 %v3994_v28  ;;  %1670 = vmatpush.msra.mxu1 %v3973_v21 }
 0x33c   :  { %v1233_v13 = vand.u32 4294901760, %v1232_v12  ;;  %1631 = vmatpush.msra.mxu0 %v4005_v31  ;;  %v2136_v12 = vsub.f32 %v1947_v4, %v2038_v8 }
 0x33d   :  { %1600 = vmatpush.msrb.mxu3 %v4010_v33  ;;  %1672 = vmatpush.msra.mxu1 %v3981_v24 }
 0x33e   :  { %1234 = vmatmul.f32.vlgmr.msrb.gmra.mxu2 %v1233_v13  ;;  %1438 = vmatmul.f32.vlgmr.msra.gmra.mxu3 %v1229_v9 }
 0x33f   :  { %1557 = vmatpush.msrb.mxu2 %v3979_v23  ;;  %1602 = vmatpush.msrb.mxu3 %v4030_v39 }
 0x340   :  { %1674 = vmatpush.msra.mxu1 %v3994_v28  ;;  %1635 = vmatpush.msra.mxu0 %v4023_v37 }
 0x341   :  { %1560 = vmatpush.msrb.mxu2 %v3992_v27  ;;  %1604 = vmatpush.msrb.mxu3 %v4044_v44 }
 0x342   :  { %1676 = vmatpush.msra.mxu1 %v4010_v33  ;;  %1639 = vmatpush.msra.mxu0 %v4042_v43 }
 0x343   :  { %1563 = vmatpush.msrb.mxu2 %v4008_v32  ;;  %1606 = vmatpush.msrb.mxu3 %v4063_v50 }
 0x344   :  { %1678 = vmatpush.msra.mxu1 %v4030_v39  ;;  %1643 = vmatpush.msra.mxu0 %v4066_v51 }
 0x345   :  { %1566 = vmatpush.msrb.mxu2 %v4026_v38  ;;  %1608 = vmatpush.msrb.mxu3 %v4082_v56 }
 0x346   :  { %1409 = vmatmul.f32.vlgmr.msra.gmra.mxu2 %v1229_v9  ;;  %1680 = vmatpush.msra.mxu1 %v4044_v44 }
 0x347   :  { %1569 = vmatpush.msrb.mxu2 %v4048_v45  ;;  %1647 = vmatpush.msra.mxu0 %v4077_v54 }
 0x348   :  { %1682 = vmatpush.msra.mxu1 %v4063_v50  ;;  %1747 = vmatpush.msra.mxu3 %v4018_v35 }
 0x349   :  { %1572 = vmatpush.msrb.mxu2 %v4061_v49  ;;  %1651 = vmatpush.msra.mxu0 %v4093_v59 }
 0x34a   :  { %1684 = vmatpush.msra.mxu1 %v4082_v56  ;;  %1753 = vmatpush.msra.mxu3 %v4037_v41 }
 0x34b   :  { %1575 = vmatpush.msrb.mxu2 %v4080_v55  ;;  %1655 = vmatpush.msra.mxu0 %v4108_v0 }
 0x34c   :  { %1759 = vmatpush.msra.mxu3 %v4056_v47 }
 0x34d   :  { %1578 = vmatpush.msrb.mxu2 %v4096_v60 }
 0x34e   :  { %1765 = vmatpush.msra.mxu3 %v4074_v53 }
 0x34f   :  { %1710 = vmatpush.msra.mxu2 %v3973_v21 }
 0x350   :  { %1771 = vmatpush.msra.mxu3 %v4099_v61 }
 0x351   :  { %1712 = vmatpush.msra.mxu2 %v3981_v24 }
 0x352   :  { %1777 = vmatpush.msra.mxu3 %v4103_v62 }
 0x353   :  { %1714 = vmatpush.msra.mxu2 %v3994_v28 }
 0x354   :  { %1783 = vmatpush.msra.mxu3 %v4114_v1 }
 0x355   :  { %1716 = vmatpush.msra.mxu2 %v4010_v33 }
 0x356   :  { %1789 = vmatpush.msra.mxu3 %v4122_v3 }
 0x357   :  { %1718 = vmatpush.msra.mxu2 %v4030_v39 }
 0x359   :  { %1720 = vmatpush.msra.mxu2 %v4044_v44 }
 0x35b   :  { %1722 = vmatpush.msra.mxu2 %v4063_v50 }
 0x35d   :  { %1724 = vmatpush.msra.mxu2 %v4082_v56 }
 0x3b5   :  { %v1334_v53 = vpop.f32.mrf.mxu0 }
 0x3b7   :  { %v1365_v62 = vpop.f32.mrf.mxu1 }
 0x3b9   :  { %v1296_v35 = vpop.f32.mrf.mxu3 }
 0x3c1   :  { %v1235_v41 = vpop.f32.mrf.mxu2  ;;  %v1439_v17 = vpop.f32.mrf.mxu3 }
 0x3c2   :  { %v1297_v47 = vadd.f32 %v1296_v35, %v1235_v41 }
 0x3c4   :  { %v1335_v61 = vadd.f32 %v1334_v53, %v1297_v47  ;;  %v2127_v47 = vand.u32 4294901760, %v2126_v10  ;;  %v2133_v53 = vand.u32 4294901760, %v2132_v11 }
 0x3c6   :  { %v1366_v14 = vadd.f32 %v1365_v62, %v1335_v61  ;;  %v2137_v61 = vand.u32 4294901760, %v2136_v12 }
 0x3c9   :  { %v1410_v1 = vpop.f32.mrf.mxu2 }
 0x3ca   :  { %v1411_v15 = vadd.f32 %v1410_v1, %v1366_v14  ;;  %v2138_v1 = vsub.f32 %v2136_v12, %v2137_v61 }
 0x3cc   :  { %v1440_v18 = vadd.f32 %v1439_v17, %v1411_v15  ;;  %v2139_v15 = vand.u32 4294901760, %v2138_v1 }
 0x3ce   :  { %v1443_v3 = vrot.slane %v1440_v18, 3 }
 0x3d0   :  { %v1445_v19 = vadd.f32 %v1443_v3, %v4157_v16 }
 0x3d2   :  { %3857 = vtanh.f32 %v1445_v19 }
 0x3d8   :  { %v3858_v20 = vpop.eup %3857 }
 0x3d9   :  { %1448 = vst.msk [vmem:[#allocation2] sm:$0x20] %vm1447_vm8, %v3858_v20  ;;  %v1450_v22 = vrot.slane %v3858_v20, 5 }
 0x3db   :  { %v1451_v25 = vsel %vm209_vm3, %v1450_v22, 0 }
 0x3dc   :  { %v1477_v29 = vand.u32 4294901760, %v1451_v25 }
 0x3de   :  { %1543 = vmatmul.f32.vlgmr.msrb.gmra.mxu1 %v1477_v29  ;;  %v1478_v30 = vsub.f32 %v1451_v25, %v1477_v29 }
 0x3df   :  { %1842 = vmatpush.msrb.mxu1 %v3973_v21 }
 0x3e0   :  { %1581 = vmatmul.f32.vlgmr.msrb.gmra.mxu2 %v1478_v30  ;;  %v1479_v34 = vand.u32 4294901760, %v1478_v30 }
 0x3e1   :  { %1844 = vmatpush.msrb.mxu1 %v3981_v24  ;;  %1875 = vmatpush.msrb.mxu2 %v3989_v26 }
 0x3e2   :  { %1612 = vmatmul.f32.vlgmr.msrb.gmra.mxu3 %v1479_v34  ;;  %v1480_v36 = vsub.f32 %v1478_v30, %v1479_v34 }
 0x3e3   :  { %1846 = vmatpush.msrb.mxu1 %v3994_v28  ;;  %1918 = vmatpush.msrb.mxu3 %v3973_v21 }
 0x3e4   :  { %v1481_v40 = vand.u32 4294901760, %v1480_v36  ;;  %1879 = vmatpush.msrb.mxu2 %v4005_v31 }
 0x3e5   :  { %1848 = vmatpush.msrb.mxu1 %v4010_v33  ;;  %1920 = vmatpush.msrb.mxu3 %v3981_v24 }
 0x3e6   :  { %1482 = vmatmul.f32.vlgmr.msrb.gmra.mxu0 %v1481_v40  ;;  %1686 = vmatmul.f32.vlgmr.msra.gmra.mxu1 %v1477_v29 }
 0x3e7   :  { %1805 = vmatpush.msrb.mxu0 %v3979_v23  ;;  %1850 = vmatpush.msrb.mxu1 %v4030_v39 }
 0x3e8   :  { %1922 = vmatpush.msrb.mxu3 %v3994_v28  ;;  %1883 = vmatpush.msrb.mxu2 %v4023_v37 }
 0x3e9   :  { %1808 = vmatpush.msrb.mxu0 %v3992_v27  ;;  %1852 = vmatpush.msrb.mxu1 %v4044_v44 }
 0x3ea   :  { %1924 = vmatpush.msrb.mxu3 %v4010_v33  ;;  %1887 = vmatpush.msrb.mxu2 %v4042_v43  ;;  %v4446_v43 = vld [vmem:[%s4723_s4] sm:$0xff] }
 0x3eb   :  { %1811 = vmatpush.msrb.mxu0 %v4008_v32  ;;  %1854 = vmatpush.msrb.mxu1 %v4063_v50 }
 0x3ec   :  { %1926 = vmatpush.msrb.mxu3 %v4030_v39  ;;  %1891 = vmatpush.msrb.mxu2 %v4066_v51 }
 0x3ed   :  { %1814 = vmatpush.msrb.mxu0 %v4026_v38  ;;  %1856 = vmatpush.msrb.mxu1 %v4082_v56 }
 0x3ee   :  { %1657 = vmatmul.f32.vlgmr.msra.gmra.mxu0 %v1477_v29  ;;  %1928 = vmatpush.msrb.mxu3 %v4044_v44 }
 0x3ef   :  { %1817 = vmatpush.msrb.mxu0 %v4048_v45  ;;  %1895 = vmatpush.msrb.mxu2 %v4077_v54 }
 0x3f0   :  { %1930 = vmatpush.msrb.mxu3 %v4063_v50  ;;  %1984 = vrot.lane.b32.xlu0 %v4446_v43, %s3921_s19 }
 0x3f1   :  { %1820 = vmatpush.msrb.mxu0 %v4061_v49  ;;  %1899 = vmatpush.msrb.mxu2 %v4093_v59 }
 0x3f2   :  { %1932 = vmatpush.msrb.mxu3 %v4082_v56 }
 0x3f3   :  { %1823 = vmatpush.msrb.mxu0 %v4080_v55  ;;  %1903 = vmatpush.msrb.mxu2 %v4108_v0 }
 0x3f5   :  { %1826 = vmatpush.msrb.mxu0 %v4096_v60  ;;  %v1950_v60 = vld [vmem:[%s4724_s5 + $0x18] sm:$0xff]  ;;  %s3922_s5 = smov 96  }
 0x3f6   :  { %v2032_v0 = vand.u32 4294901760, %v1950_v60 }
 0x3f8   :  { %v2118_v48 = vsub.f32 %v1950_v60, %v2032_v0  ;;  %2033 = vmatpush.msra.mxu0 %v2032_v0 }
 0x3fa   :  { %v2119_v58 = vand.u32 4294901760, %v2118_v48  ;;  %2035 = vmatpush.msra.mxu0 %v2034_v52 }
 0x3fc   :  { %v2120_v5 = vsub.f32 %v2118_v48, %v2119_v58  ;;  %2037 = vmatpush.msra.mxu0 %v2036_v57 }
 0x3fe   :  { %v2121_v9 = vand.u32 4294901760, %v2120_v5  ;;  %2039 = vmatpush.msra.mxu0 %v2038_v8 }
 0x400   :  { %2122 = vmatpush.msra.mxu1 %v2121_v9 }
 0x402   :  { %2128 = vmatpush.msra.mxu1 %v2127_v47 }
 0x404   :  { %2134 = vmatpush.msra.mxu1 %v2133_v53 }
 0x406   :  { %2140 = vmatpush.msra.mxu1 %v2139_v15 }
 0x45b   :  { %v1544_v21 = vpop.f32.mrf.mxu1 }
 0x462   :  { %v1985_v34 = vpop.permute.xlu0 %1984 }
 0x463   :  { %v1483_v23 = vpop.f32.mrf.mxu0  ;;  %v1582_v26 = vpop.f32.mrf.mxu2 }
 0x464   :  { %v1545_v24 = vadd.f32 %v1544_v21, %v1483_v23  ;;  %v1687_v37 = vpop.f32.mrf.mxu1 }
 0x465   :  { %v1613_v28 = vpop.f32.mrf.mxu3 }
 0x466   :  { %v1583_v27 = vadd.f32 %v1582_v26, %v1545_v24 }
 0x468   :  { %v1614_v31 = vadd.f32 %v1613_v28, %v1583_v27 }
 0x46b   :  { %v1658_v32 = vpop.f32.mrf.mxu0 }
 0x46c   :  { %v1659_v33 = vadd.f32 %v1658_v32, %v1614_v31 }
 0x46e   :  { %v1688_v38 = vadd.f32 %v1687_v37, %v1659_v33 }
 0x470   :  { %v1691_v39 = vrot.slane %v1688_v38, 2 }
 0x472   :  { %v1693_v44 = vadd.f32 %v1691_v39, %v4157_v16 }
 0x474   :  { %3859 = vtanh.f32 %v1693_v44 }
 0x47a   :  { %v3860_v45 = vpop.eup %3859 }
 0x47b   :  { %1696 = vst.msk [vmem:[#allocation2] sm:$0x40] %vm1695_vm9, %v3860_v45  ;;  %v1698_v49 = vrot.slane %v3860_v45, 6 }
 0x47d   :  { %v1699_v50 = vsel %vm209_vm3, %v1698_v49, 0 }
 0x47e   :  { %v1725_v51 = vand.u32 4294901760, %v1699_v50 }
 0x480   :  { %1791 = vmatmul.f32.vlgmr.msra.gmra.mxu3 %v1725_v51  ;;  %v1726_v54 = vsub.f32 %v1699_v50, %v1725_v51 }
 0x481   :  { %2252 = vmatpush.msra.mxu3 %v2032_v0 }
 0x482   :  { %1829 = vmatmul.f32.vlgmr.msrb.gmra.mxu0 %v1726_v54  ;;  %v1727_v55 = vand.u32 4294901760, %v1726_v54 }
 0x483   :  { %2254 = vmatpush.msra.mxu3 %v2034_v52  ;;  %2323 = vmatpush.msrb.mxu0 %v2119_v58 }
 0x484   :  { %1860 = vmatmul.f32.vlgmr.msrb.gmra.mxu1 %v1727_v55  ;;  %v1728_v56 = vsub.f32 %v1726_v54, %v1727_v55 }
 0x485   :  { %2256 = vmatpush.msra.mxu3 %v2036_v57  ;;  %2327 = vmatpush.msrb.mxu0 %v2125_v6 }
 0x486   :  { %v1729_v59 = vand.u32 4294901760, %v1728_v56  ;;  %2382 = vmatpush.msrb.mxu1 %v2032_v0 }
 0x487   :  { %2258 = vmatpush.msra.mxu3 %v2038_v8  ;;  %2331 = vmatpush.msrb.mxu0 %v2131_v7 }
 0x488   :  { %1730 = vmatmul.f32.vlgmr.msra.gmra.mxu2 %v1729_v59  ;;  %1934 = vmatmul.f32.vlgmr.msrb.gmra.mxu3 %v1725_v51 }
 0x489   :  { %2188 = vmatpush.msra.mxu2 %v2118_v48  ;;  %2335 = vmatpush.msrb.mxu0 %v2137_v61 }
 0x48a   :  { %2384 = vmatpush.msrb.mxu1 %v2034_v52 }
 0x48b   :  { %2191 = vmatpush.msra.mxu2 %v2124_v63 }
 0x48c   :  { %2386 = vmatpush.msrb.mxu1 %v2036_v57 }
 0x48d   :  { %2194 = vmatpush.msra.mxu2 %v2130_v2 }
 0x48e   :  { %2388 = vmatpush.msrb.mxu1 %v2038_v8 }
 0x48f   :  { %2197 = vmatpush.msra.mxu2 %v2136_v12 }
 0x490   :  { %1905 = vmatmul.f32.vlgmr.msrb.gmra.mxu2 %v1725_v51 }
 0x4ff   :  { %v1830_v62 = vpop.f32.mrf.mxu0 }
 0x501   :  { %v1861_v17 = vpop.f32.mrf.mxu1 }
 0x503   :  { %v1792_v13 = vpop.f32.mrf.mxu3 }
 0x50b   :  { %v1731_v35 = vpop.f32.mrf.mxu2  ;;  %v1935_v20 = vpop.f32.mrf.mxu3 }
 0x50c   :  { %v1793_v41 = vadd.f32 %v1792_v13, %v1731_v35 }
 0x50e   :  { %v1831_v14 = vadd.f32 %v1830_v62, %v1793_v41 }
 0x510   :  { %v1862_v18 = vadd.f32 %v1861_v17, %v1831_v14 }
 0x513   :  { %v1906_v3 = vpop.f32.mrf.mxu2 }
 0x514   :  { %v1907_v19 = vadd.f32 %v1906_v3, %v1862_v18 }
 0x516   :  { %v1936_v22 = vadd.f32 %v1935_v20, %v1907_v19 }
 0x518   :  { %v1939_v25 = vrot.slane %v1936_v22, 1 }
 0x51a   :  { %v1941_v29 = vadd.f32 %v1939_v25, %v4157_v16 }
 0x51c   :  { %3861 = vtanh.f32 %v1941_v29 }
 0x522   :  { %v3862_v30 = vpop.eup %3861 }
 0x523   :  { %1944 = vst.msk [vmem:[#allocation2] sm:$0x80] %vm1943_vm10, %v3862_v30 }
 0x52a   :  { %v1945_v36 = vld [vmem:[#allocation2] sm:$0xff] }
 0x52b   :  { %v1959_v40 = vperm.slane %v1945_v36, 0  ;;  %v1954_v21 = vrot.slane %v1945_v36, 3  ;;  %v1952_v23 = vrot.slane %v1945_v36, 1  ;;  %v1956_v24 = vrot.slane %v1945_v36, 5 }
 0x52c   :  { %v1953_v26 = vrot.slane %v1945_v36, 2  ;;  %v1955_v39 = vrot.slane %v1945_v36, 4  ;;  %v1958_v42 = vrot.slane %v1945_v36, 7  ;;  %v1957_v58 = vrot.slane %v1945_v36, 6 }
 0x52d   :  { %v1987_v27 = vmul.f32 %v1985_v34, %v1959_v40  ;;  %v1975_v28 = vmul.f32 %v1959_v40, %v4446_v43  ;;  %v1962_v31 = vperm.slane %v1954_v21, 0  ;;  %v1960_v32 = vperm.slane %v1952_v23, 0 }
 0x52e   :  { %v1961_v33 = vperm.slane %v1953_v26, 0  ;;  %v1964_v50 = vperm.slane %v1956_v24, 0  ;;  %v1963_v56 = vperm.slane %v1955_v39, 0  ;;  %v1966_v6 = vperm.slane %v1958_v42, 0 }
 0x52f   :  { %2423 = vrot.lane.b32.xlu0 %v1987_v27, %s3922_s5  ;;  %v1990_v16 = vmul.f32 %v1985_v34, %v1962_v31  ;;  %v1988_v37 = vmul.f32 %v1985_v34, %v1960_v32  ;;  %v1976_v38 = vmul.f32 %v1960_v32, %v4446_v43  ;;  %v1997_v44 = vsel %vm1995_vm11, %v1975_v28, 0 }
 0x530   :  { %v4471_v49 = vand.u32 4294901760, %v1997_v44  ;;  %v1977_v51 = vmul.f32 %v1961_v33, %v4446_v43  ;;  %v1992_v60 = vmul.f32 %v1985_v34, %v1964_v50  ;;  %v1991_v48 = vmul.f32 %v1985_v34, %v1963_v56 }
 0x531   :  { %2885 = vrot.lane.b32.xlu2 %v1990_v16, %s3922_s5  ;;  %2577 = vrot.lane.b32.xlu1 %v1988_v37, %s3922_s5  ;;  %v2000_v45 = vsel %vm1995_vm11, %v1976_v38, 0  ;;  %v1989_v52 = vmul.f32 %v1985_v34, %v1961_v33  ;;  %v1978_v5 = vmul.f32 %v1962_v31, %v4446_v43  ;;  %v1965_v7 = vperm.slane %v1957_v58, 0 }
 0x532   :  { %v4474_v54 = vand.u32 4294901760, %v2000_v45  ;;  %2142 = vmatmul.f32.vlgmr.msra.gmra.mxu1 %v4471_v49  ;;  %v2041_v55 = vsub.f32 %v1997_v44, %v4471_v49  ;;  %v2003_v46 = vsel %vm1995_vm11, %v1977_v51, 0  ;;  %v1994_v11 = vmul.f32 %v1985_v34, %v1966_v6 }
 0x533   :  { %v4483_v4 = vand.u32 4294901760, %v2003_v46  ;;  %v2006_v10 = vsel %vm1995_vm11, %v1978_v5, 0  ;;  %v1993_v12 = vmul.f32 %v1985_v34, %v1965_v7  ;;  %v1979_v47 = vmul.f32 %v1963_v56, %v4446_v43 }
 0x534   :  { %2200 = vmatmul.f32.vlgmr.msra.gmra.mxu2 %v2041_v55  ;;  %v2042_v59 = vand.u32 4294901760, %v2041_v55  ;;  %v2049_v0 = vsub.f32 %v2000_v45, %v4474_v54  ;;  %v4491_v41 = vand.u32 4294901760, %v2006_v10  ;;  %v1980_v17 = vmul.f32 %v1964_v50, %v4446_v43 }
 0x535   :  { %v2057_v9 = vsub.f32 %v2003_v46, %v4483_v4  ;;  %v2009_v62 = vsel %vm1995_vm11, %v1979_v47, 0  ;;  %v1981_v29 = vmul.f32 %v1965_v7, %v4446_v43  ;;  %v1982_v24 = vmul.f32 %v1966_v6, %v4446_v43 }
 0x536   :  { %2262 = vmatmul.f32.vlgmr.msra.gmra.mxu3 %v2042_v59  ;;  %v2043_v57 = vsub.f32 %v2041_v55, %v2042_v59  ;;  %v2050_v2 = vand.u32 4294901760, %v2049_v0  ;;  %v2065_v61 = vsub.f32 %v2006_v10, %v4491_v41  ;;  %v2072_v15 = vand.u32 4294901760, %v2009_v62 }
 0x537   :  { %3193 = vrot.lane.b32.xlu0 %v1992_v60, %s3922_s5  ;;  %v2058_v35 = vand.u32 4294901760, %v2057_v9  ;;  %v2012_v19 = vsel %vm1995_vm11, %v1980_v17, 0  ;;  %v2015_v36 = vsel %vm1995_vm11, %v1981_v29, 0  ;;  %v2018_v28 = vsel %vm1995_vm11, %v1982_v24, 0 }
 0x538   :  { %v2044_v63 = vand.u32 4294901760, %v2043_v57  ;;  %v2051_v8 = vsub.f32 %v2049_v0, %v2050_v2  ;;  %v2066_v1 = vand.u32 4294901760, %v2065_v61  ;;  %v2073_v3 = vsub.f32 %v2009_v62, %v2072_v15 }
 0x539   :  { %3039 = vrot.lane.b32.xlu2 %v1991_v48, %s3922_s5  ;;  %2731 = vrot.lane.b32.xlu1 %v1989_v52, %s3922_s5  ;;  %v2059_v53 = vsub.f32 %v2057_v9, %v2058_v35  ;;  %v2080_v25 = vand.u32 4294901760, %v2012_v19  ;;  %v2088_v23 = vand.u32 4294901760, %v2015_v36  ;;  %v2096_v33 = vand.u32 4294901760, %v2018_v28 }
 0x53a   :  { %2045 = vmatmul.f32.vlgmr.msra.gmra.mxu0 %v2044_v63  ;;  %2146 = vmatmul.f32.gmra.mxu1 %v4474_v54  ;;  %v2052_v13 = vand.u32 4294901760, %v2051_v8  ;;  %v2067_v18 = vsub.f32 %v2065_v61, %v2066_v1  ;;  %v2074_v22 = vand.u32 4294901760, %v2073_v3 }
 0x53b   :  { %v2060_v14 = vand.u32 4294901760, %v2059_v53  ;;  %v2081_v34 = vsub.f32 %v2012_v19, %v2080_v25  ;;  %v2089_v27 = vsub.f32 %v2015_v36, %v2088_v23  ;;  %v2097_v37 = vsub.f32 %v2018_v28, %v2096_v33 }
 0x53c   :  { %2205 = vmatmul.f32.gmra.mxu2 %v2049_v0  ;;  %v2068_v20 = vand.u32 4294901760, %v2067_v18  ;;  %v2075_v30 = vsub.f32 %v2073_v3, %v2074_v22 }
 0x53d   :  { %v2082_v21 = vand.u32 4294901760, %v2081_v34  ;;  %v2090_v32 = vand.u32 4294901760, %v2089_v27  ;;  %v2098_v39 = vand.u32 4294901760, %v2097_v37 }
 0x53e   :  { %2268 = vmatmul.f32.gmra.mxu3 %v2050_v2  ;;  %v2076_v40 = vand.u32 4294901760, %v2075_v30 }
 0x53f   :  { %v2083_v26 = vsub.f32 %v2081_v34, %v2082_v21  ;;  %v2091_v16 = vsub.f32 %v2089_v27, %v2090_v32  ;;  %v2099_v43 = vsub.f32 %v2097_v37, %v2098_v39 }
 0x541   :  { %3501 = vrot.lane.b32.xlu2 %v1994_v11, %s3922_s5  ;;  %3347 = vrot.lane.b32.xlu1 %v1993_v12, %s3922_s5  ;;  %v2084_v31 = vand.u32 4294901760, %v2083_v26  ;;  %v2092_v38 = vand.u32 4294901760, %v2091_v16  ;;  %v2100_v44 = vand.u32 4294901760, %v2099_v43 }
 0x542   :  { %2053 = vmatmul.f32.gmra.mxu0 %v2052_v13  ;;  %2150 = vmatmul.f32.gmra.mxu1 %v4483_v4 }
 0x544   :  { %2210 = vmatmul.f32.gmra.mxu2 %v2057_v9 }
 0x546   :  { %2274 = vmatmul.f32.gmra.mxu3 %v2058_v35 }
 0x54a   :  { %2061 = vmatmul.f32.gmra.mxu0 %v2060_v14  ;;  %2154 = vmatmul.f32.gmra.mxu1 %v4491_v41 }
 0x54c   :  { %2215 = vmatmul.f32.gmra.mxu2 %v2065_v61 }
 0x54e   :  { %2280 = vmatmul.f32.gmra.mxu3 %v2066_v1 }
 0x552   :  { %2069 = vmatmul.f32.gmra.mxu0 %v2068_v20  ;;  %2158 = vmatmul.f32.gmra.mxu1 %v2072_v15 }
 0x554   :  { %2220 = vmatmul.f32.gmra.mxu2 %v2073_v3 }
 0x556   :  { %2286 = vmatmul.f32.gmra.mxu3 %v2074_v22 }
 0x55a   :  { %2077 = vmatmul.f32.gmra.mxu0 %v2076_v40  ;;  %2162 = vmatmul.f32.gmra.mxu1 %v2080_v25 }
 0x55c   :  { %2225 = vmatmul.f32.gmra.mxu2 %v2081_v34 }
 0x55e   :  { %2292 = vmatmul.f32.gmra.mxu3 %v2082_v21 }
 0x562   :  { %2085 = vmatmul.f32.gmra.mxu0 %v2084_v31  ;;  %2166 = vmatmul.f32.gmra.mxu1 %v2088_v23 }
 0x564   :  { %2230 = vmatmul.f32.gmra.mxu2 %v2089_v27 }
 0x566   :  { %2298 = vmatmul.f32.gmra.mxu3 %v2090_v32 }
 0x56a   :  { %2093 = vmatmul.f32.gmra.mxu0 %v2092_v38  ;;  %2170 = vmatmul.f32.gmra.mxu1 %v2096_v33 }
 0x56c   :  { %2235 = vmatmul.f32.gmra.mxu2 %v2097_v37 }
 0x56e   :  { %2304 = vmatmul.f32.gmra.mxu3 %v2098_v39 }
 0x572   :  { %2101 = vmatmul.f32.gmra.mxu0 %v2100_v44  ;;  %2390 = vmatmul.f32.vlgmr.msrb.gmra.mxu1 %v4471_v49 }
 0x57a   :  { %2337 = vmatmul.f32.vlgmr.msrb.gmra.mxu0 %v4471_v49  ;;  %2394 = vmatmul.f32.gmra.mxu1 %v4474_v54 }
 0x582   :  { %2341 = vmatmul.f32.gmra.mxu0 %v4474_v54  ;;  %2398 = vmatmul.f32.gmra.mxu1 %v4483_v4 }
 0x58a   :  { %2345 = vmatmul.f32.gmra.mxu0 %v4483_v4  ;;  %2402 = vmatmul.f32.gmra.mxu1 %v4491_v41 }
 0x58b   :  { %v2886_v45 = vpop.permute.xlu2 %2885 }
 0x58c   :  { %v2890_v50 = vsel %vm1995_vm11, %v2886_v45, 0 }
 0x58d   :  { %v4513_v51 = vand.u32 4294901760, %v2890_v50 }
 0x58f   :  { %v4516_v55 = vsub.f32 %v2890_v50, %v4513_v51 }
 0x591   :  { %v2935_v0 = vand.u32 4294901760, %v4516_v55 }
 0x592   :  { %2349 = vmatmul.f32.gmra.mxu0 %v4491_v41  ;;  %2406 = vmatmul.f32.gmra.mxu1 %v2072_v15 }
 0x593   :  { %v2936_v48 = vsub.f32 %v4516_v55, %v2935_v0 }
 0x595   :  { %v2937_v2 = vand.u32 4294901760, %v2936_v48 }
 0x59a   :  { %2353 = vmatmul.f32.gmra.mxu0 %v2072_v15  ;;  %2410 = vmatmul.f32.gmra.mxu1 %v2080_v25 }
 0x5a1   :  { %v2424_v49 = vpop.permute.xlu0 %2423 }
 0x5a2   :  { %v2428_v54 = vsel %vm1995_vm11, %v2424_v49, 0  ;;  %2357 = vmatmul.f32.gmra.mxu0 %v2080_v25  ;;  %2414 = vmatmul.f32.gmra.mxu1 %v2088_v23 }
 0x5a3   :  { %v4519_v56 = vand.u32 4294901760, %v2428_v54  ;;  %v2578_v59 = vpop.permute.xlu1 %2577 }
 0x5a4   :  { %v2582_v34 = vsel %vm1995_vm11, %v2578_v59, 0 }
 0x5a5   :  { %v4522_v60 = vsub.f32 %v2428_v54, %v4519_v56  ;;  %2446 = vmatpush.xpose.msrb.mxu2 %v4519_v56  ;;  %v4553_v40 = vand.u32 4294901760, %v2582_v34 }
 0x5a7   :  { %v2473_v42 = vand.u32 4294901760, %v4522_v60  ;;  %v4556_v27 = vsub.f32 %v2582_v34, %v4553_v40 }
 0x5a9   :  { %2499 = vmatpush.xpose.msra.mxu2 %v4522_v60  ;;  %v2474_v46 = vsub.f32 %v4522_v60, %v2473_v42  ;;  %v2627_v37 = vand.u32 4294901760, %v4556_v27 }
 0x5aa   :  { %2361 = vmatmul.f32.gmra.mxu0 %v2088_v23  ;;  %2418 = vmatmul.f32.gmra.mxu1 %v2096_v33 }
 0x5ab   :  { %v2475_v52 = vand.u32 4294901760, %v2474_v46  ;;  %v2732_v57 = vpop.permute.xlu1 %2731  ;;  %v2628_v49 = vsub.f32 %v4556_v27, %v2627_v37 }
 0x5ac   :  { %v2736_v58 = vsel %vm1995_vm11, %v2732_v57, 0 }
 0x5ad   :  { %v4535_v63 = vand.u32 4294901760, %v2736_v58  ;;  %2476 = vmatpush.xpose.msrb.mxu3 %v2475_v52 }
 0x5af   :  { %v4539_v4 = vsub.f32 %v2736_v58, %v4535_v63  ;;  %2830 = vmatpush.xpose.msra.mxu1 %v4535_v63  ;;  %v2143_v5 = vpop.f32.mrf.mxu1  ;;  %v2629_v58 = vand.u32 4294901760, %v2628_v49 }
 0x5b1   :  { %2522 = vmatpush.xpose.msra.mxu3 %v4519_v56  ;;  %2807 = vmatpush.xpose.msra.mxu0 %v4539_v4 }
 0x5b2   :  { %2365 = vmatmul.f32.gmra.mxu0 %v2096_v33 }
 0x5b3   :  { %2938 = vmatpush.xpose.msrb.mxu1 %v2937_v2 }
 0x5b5   :  { %2908 = vmatpush.xpose.msrb.mxu0 %v4513_v51 }
 0x5b7   :  { %v2046_v6 = vpop.f32.mrf.mxu0  ;;  %v2147_v7 = vpop.f32.mrf.mxu1 }
 0x5b8   :  { %v2201_v1 = vpop.f32.mrf.mxu2  ;;  %v2144_v19 = vadd.f32 %v2143_v5, %v2046_v6 }
 0x5b9   :  { %v2263_v3 = vpop.f32.mrf.mxu3 }
 0x5ba   :  { %v2202_v30 = vadd.f32 %v2201_v1, %v2144_v19 }
 0x5bc   :  { %v2264_v21 = vadd.f32 %v2263_v3, %v2202_v30 }
 0x5bf   :  { %v2054_v8 = vpop.f32.mrf.mxu0  ;;  %v2151_v9 = vpop.f32.mrf.mxu1 }
 0x5c0   :  { %v2148_v10 = vadd.f32 %v2147_v7, %v2054_v8  ;;  %v2206_v29 = vpop.f32.mrf.mxu2 }
 0x5c1   :  { %v2269_v36 = vpop.f32.mrf.mxu3 }
 0x5c2   :  { %v2207_v32 = vadd.f32 %v2206_v29, %v2148_v10  ;;  %v3040_v29 = vpop.permute.xlu2 %3039 }
 0x5c4   :  { %v2270_v45 = vadd.f32 %v2269_v36, %v2207_v32 }
 0x5c7   :  { %v2062_v11 = vpop.f32.mrf.mxu0  ;;  %v2155_v12 = vpop.f32.mrf.mxu1 }
 0x5c8   :  { %v2211_v31 = vpop.f32.mrf.mxu2  ;;  %v2152_v38 = vadd.f32 %v2151_v9, %v2062_v11 }
 0x5c9   :  { %v2275_v39 = vpop.f32.mrf.mxu3 }
 0x5ca   :  { %v2212_v54 = vadd.f32 %v2211_v31, %v2152_v38 }
 0x5cc   :  { %v2276_v2 = vadd.f32 %v2275_v39, %v2212_v54 }
 0x5cf   :  { %v2070_v13 = vpop.f32.mrf.mxu0  ;;  %v2159_v35 = vpop.f32.mrf.mxu1 }
 0x5d0   :  { %v2216_v52 = vpop.f32.mrf.mxu2  ;;  %v2156_v5 = vadd.f32 %v2155_v12, %v2070_v13 }
 0x5d2   :  { %v2217_v9 = vadd.f32 %v2216_v52, %v2156_v5 }
 0x5d7   :  { %v2078_v41 = vpop.f32.mrf.mxu0  ;;  %v2163_v47 = vpop.f32.mrf.mxu1 }
 0x5d8   :  { %v4544_v53 = vadd.f32 %v2159_v35, %v2078_v41  ;;  %v3194_v35 = vpop.permute.xlu0 %3193  ;;  %v2221_v1 = vpop.f32.mrf.mxu2 }
 0x5df   :  { %v2086_v61 = vpop.f32.mrf.mxu0  ;;  %v2167_v62 = vpop.f32.mrf.mxu1 }
 0x5e0   :  { %v4546_v14 = vadd.f32 %v2163_v47, %v2086_v61  ;;  %v2226_v38 = vpop.f32.mrf.mxu2 }
 0x5e7   :  { %v2094_v15 = vpop.f32.mrf.mxu0  ;;  %v2171_v17 = vpop.f32.mrf.mxu1 }
 0x5e8   :  { %v4548_v18 = vadd.f32 %v2167_v62, %v2094_v15  ;;  %v3198_v62 = vsel %vm1995_vm11, %v3194_v35, 0 }
 0x5e9   :  { %v4588_v19 = vand.u32 4294901760, %v3198_v62 }
 0x5ef   :  { %v2102_v20 = vpop.f32.mrf.mxu0  ;;  %v2391_v22 = vpop.f32.mrf.mxu1 }
 0x5f0   :  { %v4550_v25 = vadd.f32 %v2171_v17, %v2102_v20  ;;  %v2222_v20 = vadd.f32 %v2221_v1, %v4544_v53  ;;  %v4600_v53 = vsub.f32 %v3198_v62, %v4588_v19 }
 0x5f7   :  { %v2338_v23 = vpop.f32.mrf.mxu0  ;;  %v2395_v26 = vpop.f32.mrf.mxu1 }
 0x5f8   :  { %v2339_v24 = vadd.f32 %v2338_v23, %v2264_v21  ;;  %v3044_v23 = vsel %vm1995_vm11, %v3040_v29, 0 }
 0x5fa   :  { %v2392_v28 = vadd.f32 %v2391_v22, %v2339_v24  ;;  %v2781_v24 = vand.u32 4294901760, %v4539_v4 }
 0x5fc   :  { %v2426_v33 = vsel %vm1995_vm11, %v2392_v28, 0 }
 0x5fd   :  { %v4559_v16 = vand.u32 4294901760, %v2426_v33 }
 0x5ff   :  { %v2448_v43 = vsub.f32 %v2426_v33, %v4559_v16  ;;  %v2342_v44 = vpop.f32.mrf.mxu0  ;;  %2478 = vmatmul.f32.vlgmr.msrb.gmra.mxu3 %v4559_v16  ;;  %v2399_v46 = vpop.f32.mrf.mxu1  ;;  %v4609_v33 = vand.u32 4294901760, %v3044_v23 }
 0x600   :  { %2570 = vmatpush.xpose.msrb.mxu3 %v4519_v56  ;;  %v2343_v59 = vadd.f32 %v2342_v44, %v2270_v45  ;;  %v2281_v56 = vpop.f32.mrf.mxu3  ;;  %v3243_v44 = vand.u32 4294901760, %v4600_v53  ;;  %v2227_v45 = vadd.f32 %v2226_v38, %v4546_v14 }
 0x601   :  { %v2449_v50 = vand.u32 4294901760, %v2448_v43  ;;  %v2282_v61 = vadd.f32 %v2281_v56, %v2217_v9  ;;  %v2231_v56 = vpop.f32.mrf.mxu2  ;;  %v3502_v9 = vpop.permute.xlu2 %3501 }
 0x602   :  { %v2396_v6 = vadd.f32 %v2395_v26, %v2343_v59 }
 0x603   :  { %v2450_v48 = vsub.f32 %v2448_v43, %v2449_v50 }
 0x604   :  { %v2580_v10 = vsel %vm1995_vm11, %v2396_v6, 0 }
 0x605   :  { %v2451_v57 = vand.u32 4294901760, %v2450_v48  ;;  %v4572_v47 = vand.u32 4294901760, %v2580_v10 }
 0x607   :  { %v2346_v7 = vpop.f32.mrf.mxu0  ;;  %2452 = vmatmul.f32.vlgmr.msrb.gmra.mxu2 %v2451_v57  ;;  %2526 = vmatmul.f32.vlgmr.msra.gmra.mxu3 %v2449_v50  ;;  %v2403_v13 = vpop.f32.mrf.mxu1  ;;  %v4584_v17 = vsub.f32 %v2580_v10, %v4572_v47 }
 0x608   :  { %v2347_v8 = vadd.f32 %v2346_v7, %v2276_v2  ;;  %2548 = vmatpush.xpose.msrb.mxu2 %v2473_v42  ;;  %2630 = vmatpush.xpose.msra.mxu3 %v2629_v58  ;;  %v2287_v30 = vpop.f32.mrf.mxu3  ;;  %v4627_v58 = vsub.f32 %v3044_v23, %v4609_v33 }
 0x609   :  { %v2603_v21 = vand.u32 4294901760, %v4584_v17 }
 0x60a   :  { %v2400_v11 = vadd.f32 %v2399_v46, %v2347_v8  ;;  %v3244_v46 = vsub.f32 %v4600_v53, %v3243_v44 }
 0x60c   :  { %v2734_v41 = vsel %vm1995_vm11, %v2400_v11, 0  ;;  %v3245_v7 = vand.u32 4294901760, %v3244_v46 }
 0x60d   :  { %v4574_v12 = vand.u32 4294901760, %v2734_v41 }
 0x60f   :  { %v4578_v60 = vsub.f32 %v2734_v41, %v4574_v12  ;;  %v2350_v42 = vpop.f32.mrf.mxu0  ;;  %2502 = vmatmul.f32.vlgmr.msra.gmra.mxu2 %v2448_v43  ;;  %2572 = vmatmul.f32.vlgmr.msrb.gmra.mxu3 %v4559_v16  ;;  %v2407_v28 = vpop.f32.mrf.mxu1  ;;  %v2604_v43 = vsub.f32 %v4584_v17, %v2603_v21 }
 0x610   :  { %v2351_v15 = vadd.f32 %v2350_v42, %v2282_v61  ;;  %2600 = vmatpush.xpose.msra.mxu2 %v4553_v40  ;;  %2676 = vmatpush.xpose.msrb.mxu3 %v4553_v40  ;;  %v2293_v49 = vpop.f32.mrf.mxu3  ;;  %v3348_v42 = vpop.permute.xlu1 %3347 }
 0x611   :  { %v2757_v3 = vand.u32 4294901760, %v4578_v60  ;;  %2810 = vmatmul.f32.vlgmr.msra.gmra.mxu0 %v4578_v60  ;;  %v2605_v59 = vand.u32 4294901760, %v2604_v43  ;;  %v2294_v52 = vadd.f32 %v2293_v49, %v2227_v45 }
 0x612   :  { %v2404_v22 = vadd.f32 %v2403_v13, %v2351_v15  ;;  %3010 = vmatpush.xpose.msra.mxu0 %v2935_v0  ;;  %v2288_v0 = vadd.f32 %v2287_v30, %v2222_v20  ;;  %v2232_v13 = vadd.f32 %v2231_v56, %v4548_v18  ;;  %v3089_v18 = vand.u32 4294901760, %v4627_v58 }
 0x613   :  { %2834 = vmatmul.f32.vlgmr.msra.gmra.mxu1 %v2757_v3  ;;  %v3352_v30 = vsel %vm1995_vm11, %v3348_v42, 0 }
 0x614   :  { %v2888_v34 = vsel %vm1995_vm11, %v2404_v22, 0  ;;  %3032 = vmatpush.xpose.msra.mxu1 %v4513_v51 }
 0x615   :  { %v2909_v36 = vand.u32 4294901760, %v2888_v34 }
 0x617   :  { %v4603_v26 = vsub.f32 %v2888_v34, %v2909_v36  ;;  %v2354_v31 = vpop.f32.mrf.mxu0  ;;  %2550 = vmatmul.f32.vlgmr.msrb.gmra.mxu2 %v4559_v16  ;;  %2632 = vmatmul.f32.vlgmr.msra.gmra.mxu3 %v4572_v47  ;;  %v2782_v16 = vsub.f32 %v4539_v4, %v2781_v24  ;;  %v2411_v6 = vpop.f32.mrf.mxu1 }
 0x618   :  { %v2355_v32 = vadd.f32 %v2354_v31, %v2288_v0  ;;  %2653 = vmatpush.xpose.msrb.mxu2 %v4556_v27  ;;  %2724 = vmatpush.xpose.msra.mxu3 %v4553_v40  ;;  %v3506_v27 = vsel %vm1995_vm11, %v3502_v9, 0 }
 0x619   :  { %v2911_v39 = vand.u32 4294901760, %v4603_v26  ;;  %v2783_v48 = vand.u32 4294901760, %v2782_v16  ;;  %v4647_v62 = vand.u32 4294901760, %v3506_v27 }
 0x61a   :  { %v2408_v50 = vadd.f32 %v2407_v28, %v2355_v32 }
 0x61b   :  { %v2912_v40 = vsub.f32 %v4603_v26, %v2911_v39  ;;  %2940 = vmatmul.f32.vlgmr.msrb.gmra.mxu1 %v2909_v36  ;;  %v4658_v20 = vsub.f32 %v3506_v27, %v4647_v62 }
 0x61c   :  { %3138 = vmatpush.xpose.msrb.mxu1 %v4609_v33  ;;  %v3042_v57 = vsel %vm1995_vm11, %v2408_v50, 0 }
 0x61d   :  { %v2913_v54 = vand.u32 4294901760, %v2912_v40  ;;  %v4631_v5 = vand.u32 4294901760, %v3042_v57  ;;  %v3551_v0 = vand.u32 4294901760, %v4658_v20 }
 0x61f   :  { %v2358_v14 = vpop.f32.mrf.mxu0  ;;  %2606 = vmatmul.f32.vlgmr.msra.gmra.mxu2 %v2605_v59  ;;  %2680 = vmatmul.f32.vlgmr.msrb.gmra.mxu3 %v2603_v21  ;;  %v4636_v11 = vsub.f32 %v3042_v57, %v4631_v5 }
 0x620   :  { %v2359_v2 = vadd.f32 %v2358_v14, %v2294_v52  ;;  %2702 = vmatpush.xpose.msra.mxu2 %v2627_v37  ;;  %2784 = vmatpush.xpose.msrb.mxu3 %v2783_v48  ;;  %v2299_v37 = vpop.f32.mrf.mxu3 }
 0x621   :  { %2914 = vmatmul.f32.vlgmr.msrb.gmra.mxu0 %v2913_v54  ;;  %v3065_v61 = vand.u32 4294901760, %v4636_v11  ;;  %v2300_v15 = vadd.f32 %v2299_v37, %v2232_v13 }
 0x622   :  { %v2412_v8 = vadd.f32 %v2411_v6, %v2359_v2  ;;  %3115 = vmatpush.xpose.msrb.mxu0 %v4627_v58 }
 0x623   :  { %3034 = vmatmul.f32.vlgmr.msra.gmra.mxu1 %v2909_v36 }
 0x624   :  { %v3196_v10 = vsel %vm1995_vm11, %v2412_v8, 0  ;;  %3246 = vmatpush.xpose.msra.mxu1 %v3245_v7 }
 0x625   :  { %v4639_v35 = vand.u32 4294901760, %v3196_v10 }
 0x627   :  { %v2362_v41 = vpop.f32.mrf.mxu0  ;;  %2656 = vmatmul.f32.vlgmr.msrb.gmra.mxu2 %v4584_v17  ;;  %2726 = vmatmul.f32.vlgmr.msra.gmra.mxu3 %v4572_v47  ;;  %v4651_v1 = vsub.f32 %v3196_v10, %v4639_v35  ;;  %v2415_v17 = vpop.f32.mrf.mxu1 }
 0x628   :  { %2754 = vmatpush.xpose.msrb.mxu2 %v4535_v63  ;;  %2878 = vmatpush.xpose.msra.mxu3 %v4535_v63  ;;  %v2236_v63 = vpop.f32.mrf.mxu2  ;;  %v2363_v29 = vadd.f32 %v2362_v41, %v2300_v15  ;;  %v2305_v21 = vpop.f32.mrf.mxu3 }
 0x629   :  { %3012 = vmatmul.f32.vlgmr.msra.gmra.mxu0 %v2909_v36  ;;  %v2237_v22 = vadd.f32 %v2236_v63, %v4550_v25  ;;  %v3219_v34 = vand.u32 4294901760, %v4651_v1  ;;  %v3090_v36 = vsub.f32 %v4627_v58, %v3089_v18  ;;  %v2758_v25 = vsub.f32 %v4578_v60, %v2757_v3 }
 0x62a   :  { %3216 = vmatpush.xpose.msra.mxu0 %v4588_v19  ;;  %v2416_v31 = vadd.f32 %v2415_v17, %v2363_v29 }
 0x62b   :  { %3142 = vmatmul.f32.vlgmr.msrb.gmra.mxu1 %v3065_v61  ;;  %v2306_v28 = vadd.f32 %v2305_v21, %v2237_v22  ;;  %v2759_v60 = vand.u32 4294901760, %v2758_v25  ;;  %v3091_v3 = vand.u32 4294901760, %v3090_v36 }
 0x62c   :  { %3340 = vmatpush.xpose.msrb.mxu1 %v4588_v19  ;;  %v3350_v32 = vsel %vm1995_vm11, %v2416_v31, 0 }
 0x62d   :  { %v3371_v45 = vand.u32 4294901760, %v3350_v32 }
 0x62f   :  { %2704 = vmatmul.f32.vlgmr.msra.gmra.mxu2 %v4572_v47  ;;  %2786 = vmatmul.f32.vlgmr.msrb.gmra.mxu3 %v4574_v12  ;;  %v2366_v23 = vpop.f32.mrf.mxu0  ;;  %v3369_v47 = vand.u32 4294901760, %v3352_v30  ;;  %v2419_v43 = vpop.f32.mrf.mxu1  ;;  %v3372_v49 = vsub.f32 %v3350_v32, %v3371_v45 }
 0x630   :  { %2856 = vmatpush.xpose.msra.mxu2 %v2781_v24  ;;  %2984 = vmatpush.xpose.msrb.mxu3 %v4513_v51  ;;  %v3220_v51 = vsub.f32 %v4651_v1, %v3219_v34  ;;  %v2367_v4 = vadd.f32 %v2366_v23, %v2306_v28  ;;  %v3552_v24 = vsub.f32 %v4658_v20, %v3551_v0 }
 0x631   :  { %3118 = vmatmul.f32.vlgmr.msrb.gmra.mxu0 %v4636_v11 }
 0x632   :  { %3318 = vmatpush.xpose.msrb.mxu0 %v3243_v44  ;;  %v3221_v38 = vand.u32 4294901760, %v3220_v51  ;;  %v3396_v44 = vsub.f32 %v3352_v30, %v3369_v47  ;;  %v2420_v16 = vadd.f32 %v2419_v43, %v2367_v4  ;;  %v3553_v50 = vand.u32 4294901760, %v3552_v24 }
 0x633   :  { %3248 = vmatmul.f32.vlgmr.msra.gmra.mxu1 %v4639_v35 }
 0x634   :  { %3446 = vmatpush.xpose.msra.mxu1 %v3369_v47  ;;  %v3504_v40 = vsel %vm1995_vm11, %v2420_v16, 0  ;;  %v3397_v46 = vand.u32 4294901760, %v3396_v44 }
 0x635   :  { %v3525_v54 = vand.u32 4294901760, %v3504_v40 }
 0x637   :  { %2760 = vmatmul.f32.vlgmr.msrb.gmra.mxu2 %v2759_v60  ;;  %2880 = vmatmul.f32.vlgmr.msra.gmra.mxu3 %v4574_v12  ;;  %v3526_v59 = vsub.f32 %v3504_v40, %v3525_v54 }
 0x638   :  { %2961 = vmatpush.xpose.msrb.mxu2 %v4516_v55  ;;  %3092 = vmatpush.xpose.msra.mxu3 %v3091_v3  ;;  %v3373_v55 = vand.u32 4294901760, %v3372_v49 }
 0x639   :  { %3222 = vmatmul.f32.vlgmr.msra.gmra.mxu0 %v3221_v38  ;;  %v3527_v48 = vand.u32 4294901760, %v3526_v59 }
 0x63a   :  { %3423 = vmatpush.xpose.msra.mxu0 %v3396_v44 }
 0x63b   :  { %3342 = vmatmul.f32.vlgmr.msrb.gmra.mxu1 %v4639_v35 }
 0x63c   :  { %3554 = vmatpush.xpose.msrb.mxu1 %v3553_v50 }
 0x63f   :  { %2858 = vmatmul.f32.vlgmr.msra.gmra.mxu2 %v4574_v12  ;;  %2988 = vmatmul.f32.vlgmr.msrb.gmra.mxu3 %v2911_v39  ;;  %v3066_v12 = vsub.f32 %v4636_v11, %v3065_v61  ;;  %v3528_v39 = vsub.f32 %v3526_v59, %v3527_v48 }
 0x640   :  { %3062 = vmatpush.xpose.msra.mxu2 %v4609_v33  ;;  %3186 = vmatpush.xpose.msrb.mxu3 %v4609_v33  ;;  %v3398_v33 = vsub.f32 %v3396_v44, %v3397_v46 }
 0x641   :  { %3320 = vmatmul.f32.vlgmr.msrb.gmra.mxu0 %v4639_v35  ;;  %v3067_v52 = vand.u32 4294901760, %v3066_v12  ;;  %v3529_v14 = vand.u32 4294901760, %v3528_v39 }
 0x642   :  { %3524 = vmatpush.xpose.msrb.mxu0 %v4647_v62  ;;  %v3399_v57 = vand.u32 4294901760, %v3398_v33 }
 0x643   :  { %3450 = vmatmul.f32.vlgmr.msra.gmra.mxu1 %v3373_v55 }
 0x644   :  { %3648 = vmatpush.xpose.msra.mxu1 %v4647_v62 }
 0x647   :  { %2964 = vmatmul.f32.vlgmr.msrb.gmra.mxu2 %v4603_v26  ;;  %3094 = vmatmul.f32.vlgmr.msra.gmra.mxu3 %v4631_v5 }
 0x648   :  { %3164 = vmatpush.xpose.msrb.mxu2 %v3089_v18  ;;  %3292 = vmatpush.xpose.msra.mxu3 %v4588_v19  ;;  %v3374_v19 = vsub.f32 %v3372_v49, %v3373_v55 }
 0x649   :  { %3426 = vmatmul.f32.vlgmr.msra.gmra.mxu0 %v3372_v49 }
 0x64a   :  { %3626 = vmatpush.xpose.msra.mxu0 %v3551_v0  ;;  %v3375_v26 = vand.u32 4294901760, %v3374_v19 }
 0x64b   :  { %3556 = vmatmul.f32.vlgmr.msrb.gmra.mxu1 %v3525_v54 }
 0x64f   :  { %3068 = vmatmul.f32.vlgmr.msra.gmra.mxu2 %v3067_v52  ;;  %3188 = vmatmul.f32.vlgmr.msrb.gmra.mxu3 %v4631_v5 }
 0x650   :  { %3269 = vmatpush.xpose.msra.mxu2 %v4600_v53  ;;  %3400 = vmatpush.xpose.msrb.mxu3 %v3399_v57 }
 0x651   :  { %3530 = vmatmul.f32.vlgmr.msrb.gmra.mxu0 %v3529_v14 }
 0x653   :  { %3650 = vmatmul.f32.vlgmr.msra.gmra.mxu1 %v3525_v54 }
 0x657   :  { %3166 = vmatmul.f32.vlgmr.msrb.gmra.mxu2 %v4631_v5  ;;  %3296 = vmatmul.f32.vlgmr.msra.gmra.mxu3 %v3219_v34 }
 0x658   :  { %3370 = vmatpush.xpose.msrb.mxu2 %v3369_v47  ;;  %3494 = vmatpush.xpose.msra.mxu3 %v3369_v47 }
 0x659   :  { %3628 = vmatmul.f32.vlgmr.msra.gmra.mxu0 %v3525_v54 }
 0x65f   :  { %3272 = vmatmul.f32.vlgmr.msra.gmra.mxu2 %v4651_v1  ;;  %3402 = vmatmul.f32.vlgmr.msrb.gmra.mxu3 %v3371_v45 }
 0x660   :  { %3472 = vmatpush.xpose.msra.mxu2 %v3397_v46  ;;  %3600 = vmatpush.xpose.msrb.mxu3 %v4647_v62 }
 0x667   :  { %3376 = vmatmul.f32.vlgmr.msrb.gmra.mxu2 %v3375_v26  ;;  %3496 = vmatmul.f32.vlgmr.msra.gmra.mxu3 %v3371_v45 }
 0x668   :  { %3577 = vmatpush.xpose.msrb.mxu2 %v4658_v20 }
 0x66f   :  { %3474 = vmatmul.f32.vlgmr.msra.gmra.mxu2 %v3371_v45  ;;  %3604 = vmatmul.f32.vlgmr.msrb.gmra.mxu3 %v3527_v48 }
 0x677   :  { %3580 = vmatmul.f32.vlgmr.msrb.gmra.mxu2 %v3526_v59 }
 0x682   :  { %v2479_v53 = vpop.f32.mrf.mxu3 }
 0x68a   :  { %v2453_v58 = vpop.f32.mrf.mxu2  ;;  %v2527_v2 = vpop.f32.mrf.mxu3 }
 0x68b   :  { %v2480_v7 = vadd.f32 %v2479_v53, %v2453_v58 }
 0x68e   :  { %v2811_v18 = vpop.f32.mrf.mxu0 }
 0x690   :  { %v2835_v63 = vpop.f32.mrf.mxu1 }
 0x692   :  { %v2503_v5 = vpop.f32.mrf.mxu2  ;;  %v2573_v6 = vpop.f32.mrf.mxu3 }
 0x693   :  { %v2504_v8 = vadd.f32 %v2503_v5, %v2480_v7 }
 0x695   :  { %v2528_v56 = vadd.f32 %v2527_v2, %v2504_v8 }
 0x698   :  { %v2941_v4 = vpop.f32.mrf.mxu1 }
 0x69a   :  { %v2551_v9 = vpop.f32.mrf.mxu2  ;;  %v2633_v10 = vpop.f32.mrf.mxu3 }
 0x69b   :  { %v2552_v11 = vadd.f32 %v2551_v9, %v2528_v56 }
 0x69d   :  { %v2574_v27 = vadd.f32 %v2573_v6, %v2552_v11 }
 0x69e   :  { %v2915_v28 = vpop.f32.mrf.mxu0 }
 0x69f   :  { %v3833_v37 = vmul.f32 -1.442695, %v2574_v27  ;;  %v2942_v12 = vadd.f32 %v2941_v4, %v2915_v28 }
 0x6a0   :  { %v3035_v55 = vpop.f32.mrf.mxu1 }
 0x6a1   :  { %3863 = vpow2.f32 %v3833_v37 }
 0x6a2   :  { %v2607_v35 = vpop.f32.mrf.mxu2  ;;  %v2681_v41 = vpop.f32.mrf.mxu3 }
 0x6a3   :  { %v2634_v42 = vadd.f32 %v2633_v10, %v2607_v35 }
 0x6a6   :  { %v3013_v45 = vpop.f32.mrf.mxu0 }
 0x6a7   :  { %v3864_v13 = vpop.eup %3863 }
 0x6a8   :  { %v3678_v61 = vadd.f32 1.0, %v3864_v13  ;;  %v3143_v5 = vpop.f32.mrf.mxu1 }
 0x6aa   :  { %3865 = vrcp.f32 %v3678_v61  ;;  %v2657_v62 = vpop.f32.mrf.mxu2  ;;  %v2727_v1 = vpop.f32.mrf.mxu3  ;;  %v3697_v21 = vand.u32 2147483648, %v3678_v61  ;;  %v3695_v23 = vand.u32 2147483647, %v3678_v61  ;;  %vm3691_vm13 = vweird.f32 %v3678_v61 }
 0x6ab   :  { %v2658_v15 = vadd.f32 %v2657_v62, %v2634_v42 }
 0x6ac   :  { %v3698_v51 = vor.u32 1.1754944e-38, %v3697_v21  ;;  %vm3696_vm0 = vcmp.eq.f32.partialorder %v3695_v23, 8.507059e+37 }
 0x6ad   :  { %v2682_v22 = vadd.f32 %v2681_v41, %v2658_v15 }
 0x6ae   :  { %v3119_v19 = vpop.f32.mrf.mxu0 }
 0x6b0   :  { %v3866_v17 = vpop.eup %3865  ;;  %v3249_v42 = vpop.f32.mrf.mxu1 }
 0x6b1   :  { %v3687_v20 = vmul.f32 %v3866_v17, %v3678_v61  ;;  %vm3692_vm12 = vweird.f32 %v3866_v17 }
 0x6b2   :  { %v2705_v29 = vpop.f32.mrf.mxu2  ;;  %v2787_v30 = vpop.f32.mrf.mxu3  ;;  %vm3693_vm14 = vmor %vm3691_vm13, %vm3692_vm12 }
 0x6b3   :  { %v3688_v34 = vsub.f32 1.0, %v3687_v20  ;;  %v2706_v36 = vadd.f32 %v2705_v29, %v2682_v22 }
 0x6b5   :  { %v3689_v25 = vmul.f32 %v3866_v17, %v3688_v34  ;;  %v2728_v0 = vadd.f32 %v2727_v1, %v2706_v36 }
 0x6b6   :  { %v3223_v62 = vpop.f32.mrf.mxu0 }
 0x6b7   :  { %v3690_v47 = vadd.f32 %v3866_v17, %v3689_v25  ;;  %v3834_v31 = vmul.f32 -1.442695, %v2728_v0 }
 0x6b8   :  { %v3343_v4 = vpop.f32.mrf.mxu1 }
 0x6b9   :  { %v3694_v60 = vsel %vm3693_vm14, %v3866_v17, %v3690_v47  ;;  %3867 = vpow2.f32 %v3834_v31  ;;  %v3250_v31 = vadd.f32 %v3249_v42, %v3223_v62 }
 0x6ba   :  { %v3699_v3 = vsel %vm3696_vm0, %v3698_v51, %v3694_v60  ;;  %v2761_v24 = vpop.f32.mrf.mxu2  ;;  %v2881_v32 = vpop.f32.mrf.mxu3 }
 0x6bb   :  { %3807 = vst.msk [vmem:[#allocation3] sm:$0xff] %vm3806_vm15, %v3699_v3  ;;  %v2788_v38 = vadd.f32 %v2787_v30, %v2761_v24 }
 0x6bd   :  { %v2812_v43 = vadd.f32 %v2811_v18, %v2788_v38 }
 0x6be   :  { %v3321_v47 = vpop.f32.mrf.mxu0 }
 0x6bf   :  { %v3868_v44 = vpop.eup %3867  ;;  %v2836_v50 = vadd.f32 %v2835_v63, %v2812_v43 }
 0x6c0   :  { %v3679_v16 = vadd.f32 1.0, %v3868_v44 }
 0x6c2   :  { %3869 = vrcp.f32 %v3679_v16  ;;  %v2859_v40 = vpop.f32.mrf.mxu2  ;;  %v2989_v49 = vpop.f32.mrf.mxu3  ;;  %v3712_v26 = vand.u32 2147483648, %v3679_v16  ;;  %v3710_v58 = vand.u32 2147483647, %v3679_v16  ;;  %vm3706_vm2 = vweird.f32 %v3679_v16 }
 0x6c3   :  { %v2860_v54 = vadd.f32 %v2859_v40, %v2836_v50 }
 0x6c4   :  { %v3713_v56 = vor.u32 1.1754944e-38, %v3712_v26  ;;  %vm3711_vm4 = vcmp.eq.f32.partialorder %v3710_v58, 8.507059e+37 }
 0x6c5   :  { %v2882_v59 = vadd.f32 %v2881_v32, %v2860_v54 }
 0x6c7   :  { %v3835_v46 = vmul.f32 -1.442695, %v2882_v59 }
 0x6c8   :  { %v3870_v48 = vpop.eup %3869 }
 0x6c9   :  { %v3702_v33 = vmul.f32 %v3870_v48, %v3679_v16  ;;  %3871 = vpow2.f32 %v3835_v46  ;;  %vm3707_vm1 = vweird.f32 %v3870_v48  ;;  %v3427_v46 = vpop.f32.mrf.mxu0 }
 0x6ca   :  { %v2965_v39 = vpop.f32.mrf.mxu2  ;;  %v3095_v52 = vpop.f32.mrf.mxu3  ;;  %vm3708_vm3 = vmor %vm3706_vm2, %vm3707_vm1 }
 0x6cb   :  { %v3703_v57 = vsub.f32 1.0, %v3702_v33  ;;  %v2966_v14 = vadd.f32 %v2965_v39, %v2942_v12 }
 0x6cd   :  { %v3704_v53 = vmul.f32 %v3870_v48, %v3703_v57  ;;  %v2990_v2 = vadd.f32 %v2989_v49, %v2966_v14 }
 0x6cf   :  { %v3872_v6 = vpop.eup %3871  ;;  %v3705_v7 = vadd.f32 %v3870_v48, %v3704_v53  ;;  %v3014_v8 = vadd.f32 %v3013_v45, %v2990_v2 }
 0x6d0   :  { %v3680_v9 = vadd.f32 1.0, %v3872_v6 }
 0x6d1   :  { %v3709_v10 = vsel %vm3708_vm3, %v3870_v48, %v3705_v7  ;;  %v3036_v11 = vadd.f32 %v3035_v55, %v3014_v8 }
 0x6d2   :  { %v3714_v27 = vsel %vm3711_vm4, %v3713_v56, %v3709_v10  ;;  %3873 = vrcp.f32 %v3680_v9  ;;  %v3069_v37 = vpop.f32.mrf.mxu2  ;;  %v3189_v13 = vpop.f32.mrf.mxu3  ;;  %v3727_v29 = vand.u32 2147483648, %v3680_v9  ;;  %v3725_v36 = vand.u32 2147483647, %v3680_v9 }
 0x6d3   :  { %3808 = vst.msk [vmem:[#allocation3 + $0x8] sm:$0xff] %vm3806_vm15, %v3714_v27  ;;  %v3836_v35 = vmul.f32 -1.442695, %v3036_v11  ;;  %v3096_v41 = vadd.f32 %v3095_v52, %v3069_v37  ;;  %vm3721_vm6 = vweird.f32 %v3680_v9  ;;  %v3451_v52 = vpop.f32.mrf.mxu1 }
 0x6d4   :  { %v3728_v28 = vor.u32 1.1754944e-38, %v3727_v29  ;;  %vm3726_vm8 = vcmp.eq.f32.partialorder %v3725_v36, 8.507059e+37 }
 0x6d5   :  { %3875 = vpow2.f32 %v3836_v35  ;;  %v3120_v61 = vadd.f32 %v3119_v19, %v3096_v41 }
 0x6d7   :  { %v3144_v18 = vadd.f32 %v3143_v5, %v3120_v61 }
 0x6d8   :  { %v3874_v1 = vpop.eup %3873 }
 0x6d9   :  { %v3717_v15 = vmul.f32 %v3874_v1, %v3680_v9  ;;  %vm3722_vm5 = vweird.f32 %v3874_v1  ;;  %v3531_v9 = vpop.f32.mrf.mxu0 }
 0x6da   :  { %v3167_v63 = vpop.f32.mrf.mxu2  ;;  %v3297_v25 = vpop.f32.mrf.mxu3  ;;  %vm3723_vm7 = vmor %vm3721_vm6, %vm3722_vm5 }
 0x6db   :  { %v3876_v17 = vpop.eup %3875  ;;  %v3718_v20 = vsub.f32 1.0, %v3717_v15  ;;  %v3168_v22 = vadd.f32 %v3167_v63, %v3144_v18  ;;  %v3557_v41 = vpop.f32.mrf.mxu1 }
 0x6dc   :  { %v3681_v30 = vadd.f32 1.0, %v3876_v17 }
 0x6dd   :  { %v3719_v34 = vmul.f32 %v3874_v1, %v3718_v20  ;;  %v3190_v21 = vadd.f32 %v3189_v13, %v3168_v22 }
 0x6de   :  { %3877 = vrcp.f32 %v3681_v30  ;;  %v3742_v50 = vand.u32 2147483648, %v3681_v30  ;;  %v3740_v55 = vand.u32 2147483647, %v3681_v30  ;;  %vm3736_vm10 = vweird.f32 %v3681_v30 }
 0x6df   :  { %v3720_v23 = vadd.f32 %v3874_v1, %v3719_v34  ;;  %v3837_v0 = vmul.f32 -1.442695, %v3190_v21 }
 0x6e0   :  { %v3743_v57 = vor.u32 1.1754944e-38, %v3742_v50  ;;  %vm3741_vm12 = vcmp.eq.f32.partialorder %v3740_v55, 8.507059e+37 }
 0x6e1   :  { %v3724_v51 = vsel %vm3723_vm7, %v3874_v1, %v3720_v23  ;;  %3879 = vpow2.f32 %v3837_v0  ;;  %v3558_v1 = vadd.f32 %v3557_v41, %v3531_v9 }
 0x6e2   :  { %v3729_v60 = vsel %vm3726_vm8, %v3728_v28, %v3724_v51  ;;  %v3273_v3 = vpop.f32.mrf.mxu2  ;;  %v3403_v49 = vpop.f32.mrf.mxu3 }
 0x6e3   :  { %3809 = vst.msk [vmem:[#allocation3 + $0x10] sm:$0xff] %vm3806_vm15, %v3729_v60  ;;  %v3274_v24 = vadd.f32 %v3273_v3, %v3250_v31 }
 0x6e4   :  { %v3878_v32 = vpop.eup %3877 }
 0x6e5   :  { %v3732_v38 = vmul.f32 %v3878_v32, %v3681_v30  ;;  %v3298_v43 = vadd.f32 %v3297_v25, %v3274_v24  ;;  %vm3737_vm9 = vweird.f32 %v3878_v32  ;;  %v3629_v30 = vpop.f32.mrf.mxu0  ;;  %v3651_v25 = vpop.f32.mrf.mxu1 }
 0x6e6   :  { %vm3738_vm11 = vmor %vm3736_vm10, %vm3737_vm9 }
 0x6e7   :  { %v3880_v44 = vpop.eup %3879  ;;  %v3733_v16 = vsub.f32 1.0, %v3732_v38  ;;  %v3322_v45 = vadd.f32 %v3321_v47, %v3298_v43 }
 0x6e8   :  { %v3682_v40 = vadd.f32 1.0, %v3880_v44 }
 0x6e9   :  { %v3734_v54 = vmul.f32 %v3878_v32, %v3733_v16  ;;  %v3344_v59 = vadd.f32 %v3343_v4, %v3322_v45 }
 0x6ea   :  { %3881 = vrcp.f32 %v3682_v40  ;;  %v3377_v48 = vpop.f32.mrf.mxu2  ;;  %v3497_v5 = vpop.f32.mrf.mxu3  ;;  %v3757_v10 = vand.u32 2147483648, %v3682_v40  ;;  %v3755_v37 = vand.u32 2147483647, %v3682_v40  ;;  %vm3751_vm14 = vweird.f32 %v3682_v40 }
 0x6eb   :  { %v3735_v12 = vadd.f32 %v3878_v32, %v3734_v54  ;;  %v3838_v33 = vmul.f32 -1.442695, %v3344_v59  ;;  %v3404_v39 = vadd.f32 %v3403_v49, %v3377_v48 }
 0x6ec   :  { %v3758_v62 = vor.u32 1.1754944e-38, %v3757_v10  ;;  %vm3756_vm1 = vcmp.eq.f32.partialorder %v3755_v37, 8.507059e+37 }
 0x6ed   :  { %v3739_v14 = vsel %vm3738_vm11, %v3878_v32, %v3735_v12  ;;  %3883 = vpow2.f32 %v3838_v33  ;;  %v3428_v19 = vadd.f32 %v3427_v46, %v3404_v39 }
 0x6ee   :  { %v3744_v26 = vsel %vm3741_vm12, %v3743_v57, %v3739_v14 }
 0x6ef   :  { %3810 = vst.msk [vmem:[#allocation3 + $0x18] sm:$0xff] %vm3806_vm15, %v3744_v26  ;;  %v3452_v2 = vadd.f32 %v3451_v52, %v3428_v19 }
 0x6f0   :  { %v3882_v53 = vpop.eup %3881 }
 0x6f1   :  { %v3747_v58 = vmul.f32 %v3882_v53, %v3682_v40  ;;  %vm3752_vm13 = vweird.f32 %v3882_v53 }
 0x6f2   :  { %v3475_v6 = vpop.f32.mrf.mxu2  ;;  %vm3753_vm0 = vmor %vm3751_vm14, %vm3752_vm13  ;;  %v3605_v20 = vpop.f32.mrf.mxu3 }
 0x6f3   :  { %v3884_v7 = vpop.eup %3883  ;;  %v3748_v8 = vsub.f32 1.0, %v3747_v58  ;;  %v3476_v56 = vadd.f32 %v3475_v6, %v3452_v2 }
 0x6f4   :  { %v3683_v11 = vadd.f32 1.0, %v3884_v7 }
 0x6f5   :  { %v3749_v27 = vmul.f32 %v3882_v53, %v3748_v8  ;;  %v3498_v35 = vadd.f32 %v3497_v5, %v3476_v56 }
 0x6f6   :  { %3885 = vrcp.f32 %v3683_v11  ;;  %v3772_v23 = vand.u32 2147483648, %v3683_v11  ;;  %v3770_v28 = vand.u32 2147483647, %v3683_v11  ;;  %vm3766_vm3 = vweird.f32 %v3683_v11 }
 0x6f7   :  { %v3750_v13 = vadd.f32 %v3882_v53, %v3749_v27  ;;  %v3839_v61 = vmul.f32 -1.442695, %v3498_v35 }
 0x6f8   :  { %v3773_v60 = vor.u32 1.1754944e-38, %v3772_v23  ;;  %vm3771_vm5 = vcmp.eq.f32.partialorder %v3770_v28, 8.507059e+37 }
 0x6f9   :  { %v3754_v42 = vsel %vm3753_vm0, %v3882_v53, %v3750_v13  ;;  %3887 = vpow2.f32 %v3839_v61 }
 0x6fa   :  { %v3759_v15 = vsel %vm3756_vm1, %v3758_v62, %v3754_v42  ;;  %v3581_v18 = vpop.f32.mrf.mxu2 }
 0x6fb   :  { %3811 = vst.msk [vmem:[#allocation3 + $0x20] sm:$0xff] %vm3806_vm15, %v3759_v15  ;;  %v3582_v63 = vadd.f32 %v3581_v18, %v3558_v1 }
 0x6fc   :  { %v3886_v17 = vpop.eup %3885 }
 0x6fd   :  { %v3762_v22 = vmul.f32 %v3886_v17, %v3683_v11  ;;  %v3606_v29 = vadd.f32 %v3605_v20, %v3582_v63  ;;  %vm3767_vm2 = vweird.f32 %v3886_v17 }
 0x6fe   :  { %vm3768_vm4 = vmor %vm3766_vm3, %vm3767_vm2 }
 0x6ff   :  { %v3888_v34 = vpop.eup %3887  ;;  %v3763_v36 = vsub.f32 1.0, %v3762_v22  ;;  %v3630_v21 = vadd.f32 %v3629_v30, %v3606_v29 }
 0x700   :  { %v3684_v0 = vadd.f32 1.0, %v3888_v34 }
 0x701   :  { %v3764_v47 = vmul.f32 %v3886_v17, %v3763_v36  ;;  %v3652_v31 = vadd.f32 %v3651_v25, %v3630_v21 }
 0x702   :  { %3889 = vrcp.f32 %v3684_v0  ;;  %v3787_v16 = vand.u32 2147483648, %v3684_v0  ;;  %v3785_v40 = vand.u32 2147483647, %v3684_v0  ;;  %vm3781_vm7 = vweird.f32 %v3684_v0 }
 0x703   :  { %v3765_v51 = vadd.f32 %v3886_v17, %v3764_v47  ;;  %v3840_v4 = vmul.f32 -1.442695, %v3652_v31 }
 0x704   :  { %v3788_v54 = vor.u32 1.1754944e-38, %v3787_v16  ;;  %vm3786_vm9 = vcmp.eq.f32.partialorder %v3785_v40, 8.507059e+37 }
 0x705   :  { %v3769_v3 = vsel %vm3768_vm4, %v3886_v17, %v3765_v51  ;;  %3891 = vpow2.f32 %v3840_v4 }
 0x706   :  { %v3774_v24 = vsel %vm3771_vm5, %v3773_v60, %v3769_v3 }
 0x707   :  { %3812 = vst.msk [vmem:[#allocation3 + $0x28] sm:$0xff] %vm3806_vm15, %v3774_v24 }
 0x708   :  { %v3890_v32 = vpop.eup %3889 }
 0x709   :  { %v3777_v38 = vmul.f32 %v3890_v32, %v3684_v0  ;;  %vm3782_vm6 = vweird.f32 %v3890_v32 }
 0x70a   :  { %vm3783_vm8 = vmor %vm3781_vm7, %vm3782_vm6 }
 0x70b   :  { %v3892_v43 = vpop.eup %3891  ;;  %v3778_v44 = vsub.f32 1.0, %v3777_v38 }
 0x70c   :  { %v3685_v45 = vadd.f32 1.0, %v3892_v43 }
 0x70d   :  { %v3779_v50 = vmul.f32 %v3890_v32, %v3778_v44 }
 0x70e   :  { %3893 = vrcp.f32 %v3685_v45  ;;  %v3802_v33 = vand.u32 2147483648, %v3685_v45  ;;  %v3800_v52 = vand.u32 2147483647, %v3685_v45  ;;  %vm3796_vm11 = vweird.f32 %v3685_v45 }
 0x70f   :  { %v3780_v49 = vadd.f32 %v3890_v32, %v3779_v50 }
 0x710   :  { %v3803_v14 = vor.u32 1.1754944e-38, %v3802_v33  ;;  %vm3801_vm13 = vcmp.eq.f32.partialorder %v3800_v52, 8.507059e+37 }
 0x711   :  { %v3784_v55 = vsel %vm3783_vm8, %v3890_v32, %v3780_v49 }
 0x712   :  { %v3789_v59 = vsel %vm3786_vm9, %v3788_v54, %v3784_v55 }
 0x713   :  { %3813 = vst.msk [vmem:[#allocation3 + $0x30] sm:$0xff] %vm3806_vm15, %v3789_v59 }
 0x714   :  { %v3894_v46 = vpop.eup %3893 }
 0x715   :  { %v3792_v48 = vmul.f32 %v3894_v46, %v3685_v45  ;;  %vm3797_vm10 = vweird.f32 %v3894_v46 }
 0x716   :  { %vm3798_vm12 = vmor %vm3796_vm11, %vm3797_vm10 }
 0x717   :  { %v3793_v12 = vsub.f32 1.0, %v3792_v48 }
 0x719   :  { %v3794_v39 = vmul.f32 %v3894_v46, %v3793_v12 }
 0x71b   :  { %v3795_v57 = vadd.f32 %v3894_v46, %v3794_v39 }
 0x71d   :  { %v3799_v19 = vsel %vm3798_vm12, %v3894_v46, %v3795_v57 }
 0x71e   :  { %v3804_v26 = vsel %vm3801_vm13, %v3803_v14, %v3799_v19 }
 0x71f   :  { %3814 = vst.msk [vmem:[#allocation3 + $0x38] sm:$0xff] %vm3806_vm15, %v3804_v26 }
 0x720   :  { %3827 = dma.vmem_to_hbm [thread:$0]  %s3820_s1, 1024, %s3822_s29, [#allocation4], %s3924_s30, %s3924_s30, %s3925_s7  }
 0x721   :  { %3919 = dma.done.wait [#allocation4], 1024  }
 0x722   :  { %3920 = vsyncadd [#allocation4], 4294966272 }
 0x723   :  { %3832 = vsyncpa [#allocation4], 1 }

</bundles_post_ra>
